<compile_context>
chip_gen: v7x
topology: tpu7x:2x2x1
jax: 0.10.0
libtpu: 0.0.40
codegen_flags: <defaults>
</compile_context>

<pallas_src>
import jax
import jax.numpy as jnp
import numpy as np
from jax.experimental import pallas as pl
from jax.experimental.pallas import tpu as pltpu


# ---------------------------------------------------------------------------
# Kernel
# ---------------------------------------------------------------------------
def readout_kernel(node_ref, nn_ref,
                   wlg_ref, wln_ref, bl_ref, wp_ref, bp_ref,
                   wru_ref, bru_ref, win_ref, bin_ref, whn_ref, bhn_ref,
                   out_ref):
    TG, Np, Fp = node_ref.shape
    T = wp_ref.shape[0]

    x = node_ref[...]                                # (TG, Np, Fp), pre-masked
    # Np % 8 == 0 and Fp % 128 == 0, so this merge is layout-preserving.
    x2d = x.reshape(TG * Np, Fp)

    # Node-validity mask regenerated in-kernel from per-graph node counts.
    nn = nn_ref[...]                                 # (TG, 1, 1) int32
    node_idx = jax.lax.broadcasted_iota(jnp.int32, (TG, Np, 1), 1)
    valid = node_idx < nn                            # (TG, Np, 1) bool

    # Loop-invariant per-node logit contribution for ALL timesteps (one matmul):
    # zn_all[..., t] == <node_feats, wln_t>
    zn_all = jnp.dot(x2d, wln_ref[...],
                     preferred_element_type=jnp.float32).reshape(TG, Np, T)

    # g_feats = dgl.sum_nodes(g, 'hv'); x is pre-masked, so plain sum.
    g_feats = jnp.sum(x, axis=1)                     # (TG, Fp)

    for t in range(T):                               # static unroll over timesteps
        # compute_logits: Linear(2F -> 1) + LeakyReLU on [relu(g_feats) || node_feats]
        gb = jnp.maximum(g_feats, 0.0)
        zg = jnp.sum(gb * wlg_ref[t], axis=-1, keepdims=True)        # (TG, 1)
        z = zg[:, None, :] + zn_all[:, :, t:t + 1] + bl_ref[t]       # (TG, Np, 1)
        z = jnp.where(z >= 0.0, z, 0.01 * z)                         # LeakyReLU(0.01)

        # dgl.softmax_nodes: masked softmax over nodes within each graph
        z = jnp.where(valid, z, jnp.float32(-1e30))
        zmax = jnp.max(z, axis=1, keepdims=True)                     # (TG, 1, 1)
        e = jnp.where(valid, jnp.exp(z - zmax), 0.0)
        denom = jnp.maximum(jnp.sum(e, axis=1, keepdims=True),
                            jnp.float32(1e-20))                      # guard empty graphs
        a = e * pl.reciprocal(denom, approx=True)                    # (TG, Np, 1)

        # Re-associated projection: sum_n a*(x Wp + bp) == (sum_n a*x) Wp + bp
        # (sum_n a == 1 for any graph with >= 1 valid node).
        s = jnp.sum(a * x, axis=1)                                   # (TG, Fp)
        g_repr = jnp.dot(s, wp_ref[t],
                         preferred_element_type=jnp.float32) + bp_ref[t]
        context = jnp.where(g_repr > 0.0, g_repr,
                            jnp.exp(jnp.minimum(g_repr, 0.0)) - 1.0)  # ELU

        # GRUCell(context, g_feats): r/u gates fused into one K = 2*Fp matmul.
        cat = jnp.concatenate([context, g_feats], axis=-1)           # (TG, 2Fp)
        ru = jnp.dot(cat, wru_ref[t],
                     preferred_element_type=jnp.float32) + bru_ref[t]
        r = jax.nn.sigmoid(ru[:, :Fp])
        u = jax.nn.sigmoid(ru[:, Fp:])
        an = jnp.dot(context, win_ref[t],
                     preferred_element_type=jnp.float32) + bin_ref[t]
        bn = jnp.dot(g_feats, whn_ref[t],
                     preferred_element_type=jnp.float32) + bhn_ref[t]
        n = jnp.tanh(an + r * bn)
        g_feats = (1.0 - u) * n + u * g_feats

    out_ref[...] = g_feats


# ---------------------------------------------------------------------------
# Wrapper: padding, tiling, parameter re-layout
# ---------------------------------------------------------------------------
def _round_up(x, m):
    return (x + m - 1) // m * m


def _vmem_capacity_bytes():
    try:
        info = pltpu.get_tpu_info()
        cap = getattr(info, "vmem_capacity_bytes", None)
        if cap:
            return int(cap)
    except Exception:
        pass
    return 64 << 20   # conservative fallback (v7x per-core); v5e/v6e have 128 MiB


def _pick_tile_g(G, Np, Fp, param_bytes, vmem_cap):
    """Largest graph tile whose streamed footprint (double-buffered node tile,
    num_nodes block, output block, in-kernel temporaries) fits a generation-
    aware VMEM budget after reserving the resident (double-buffered) params.
    Capped so the grid has >= 2 steps when the batch allows it (v7x megacore)."""
    budget = max(int(vmem_cap * 0.45) - 2 * param_bytes, 4 << 20)
    g8 = _round_up(max(G, 8), 8)
    cand = 1024
    while cand > 8:
        streamed = (2 * cand * Np * Fp * 4        # node tile (double-buffered)
                    + 2 * cand * 8 * 128 * 4      # num_nodes block (tile-padded)
                    + 2 * cand * Fp * 4           # output block
                    + 2 * cand * Np * Fp * 4)     # elementwise temps / zn_all
        if streamed <= budget:
            break
        cand //= 2
    tg = max(8, min(cand, g8))
    if g8 >= 16:                                  # keep >= 2 grid steps (megacore)
        tg = min(tg, _round_up(g8 // 2, 8))
    return tg


def _prepare_params(params, Fp):
    """Reference-layout params -> kernel layout (zero-padded to Fp, fused)."""
    wlg, wln, bl, wp, bp, wih, bih, whh, bhh = params
    T = wp.shape[0]

    def pad_f(a, axes):
        pads = [(0, 0)] * a.ndim
        for ax in axes:
            pads[ax] = (0, Fp - a.shape[ax])
        return jnp.pad(a, pads)

    wlg_k = pad_f(wlg, [2])                        # (T, 1, Fp)
    wln_cat = pad_f(wln, [2]).reshape(T, Fp).T     # (Fp, T)
    bl_k = bl                                      # (T, 1, 1)
    wp_k = pad_f(wp, [1, 2])                       # (T, Fp, Fp)
    bp_k = pad_f(bp, [2])                          # (T, 1, Fp)

    wih_p = pad_f(wih, [2, 3])                     # (T, 3, Fp, Fp)  gates [r, z, n]
    whh_p = pad_f(whh, [2, 3])
    bih_p = pad_f(bih, [3])                        # (T, 3, 1, Fp)
    bhh_p = pad_f(bhh, [3])

    # r/u gates fused: input is [context | g_feats]; rows 0:Fp = context path,
    # rows Fp:2Fp = hidden path; columns 0:Fp = r gate, Fp:2Fp = u (z) gate.
    w_ru = jnp.concatenate(
        [jnp.concatenate([wih_p[:, 0], wih_p[:, 1]], axis=2),
         jnp.concatenate([whh_p[:, 0], whh_p[:, 1]], axis=2)], axis=1)   # (T, 2Fp, 2Fp)
    b_ru = jnp.concatenate([bih_p[:, 0] + bhh_p[:, 0],
                            bih_p[:, 1] + bhh_p[:, 1]], axis=2)          # (T, 1, 2Fp)
    w_in, b_in = wih_p[:, 2], bih_p[:, 2]          # n gate, context path
    w_hn, b_hn = whh_p[:, 2], bhh_p[:, 2]          # n gate, hidden path

    return (wlg_k, wln_cat, bl_k, wp_k, bp_k, w_ru, b_ru, w_in, b_in, w_hn, b_hn)


def attentive_fp_readout(node_feats, mask, params):
    """node_feats: (G, N, F) f32; mask: (G, N, 1) f32 node-validity mask with
    prefix padding (valid nodes first, as produced by dense graph batching).
    Returns (G, F) f32 graph representations."""
    G, N, F = node_feats.shape
    Fp = _round_up(F, 128)
    Np = _round_up(max(N, 8), 8)

    kparams = _prepare_params(params, Fp)
    param_bytes = sum(int(np.prod(p.shape)) * 4 for p in kparams)
    vmem_cap = _vmem_capacity_bytes()
    TG = _pick_tile_g(G, Np, Fp, param_bytes, vmem_cap)
    Gp = _round_up(max(G, TG), TG)

    # Pre-mask node features (padded node rows are exactly zero in the kernel)
    # and reduce the per-node mask to per-graph node counts.
    x = jnp.zeros((Gp, Np, Fp), jnp.float32).at[:G, :N, :F].set(node_feats * mask)
    # TODO(synk): assumes valid nodes form a prefix per graph (standard dense
    # padded batching); arbitrary scatter masks would need the mask streamed.
    num_nodes = jnp.sum((mask[..., 0] > 0).astype(jnp.int32), axis=1)
    nn = jnp.zeros((Gp, 1, 1), jnp.int32).at[:G, 0, 0].set(num_nodes)

    in_specs = [
        pl.BlockSpec((TG, Np, Fp), lambda i: (i, 0, 0)),   # node tile (streamed)
        pl.BlockSpec((TG, 1, 1), lambda i: (i, 0, 0)),     # per-graph node counts
    ] + [
        # parameters: full array, constant index_map -> resident across grid
        pl.BlockSpec(p.shape, lambda i, nd=p.ndim: (0,) * nd) for p in kparams
    ]

    out = pl.pallas_call(
        readout_kernel,
        out_shape=jax.ShapeDtypeStruct((Gp, Fp), jnp.float32),
        grid=(Gp // TG,),
        in_specs=in_specs,
        out_specs=pl.BlockSpec((TG, Fp), lambda i: (i, 0)),
        compiler_params=pltpu.CompilerParams(
            dimension_semantics=("parallel",),
            vmem_limit_bytes=int(vmem_cap * 0.75)),
    )(x, nn, *kparams)
    return out[:G, :F]


# ---------------------------------------------------------------------------
# Pure-JAX reference (identical math, reference parameter layout)
# ---------------------------------------------------------------------------
def reference_readout(node_feats, mask, params):
    wlg, wln, bl, wp, bp, wih, bih, whh, bhh = params
    T = wp.shape[0]
    x, m = node_feats, mask
    g_feats = jnp.sum(x * m, axis=1)
    for t in range(T):
        gb = jnp.maximum(g_feats, 0.0)
        zg = jnp.sum(gb * wlg[t], axis=-1, keepdims=True)
        zn = jnp.sum(x * wln[t][None], axis=-1, keepdims=True)
        z = zg[:, None, :] + zn + bl[t][None]
        z = jnp.where(z >= 0.0, z, 0.01 * z)
        z = jnp.where(m > 0.0, z, -1e30)
        zmax = jnp.max(z, axis=1, keepdims=True)
        e = jnp.exp(z - zmax) * m
        a = e / jnp.sum(e, axis=1, keepdims=True)
        hv = jnp.einsum("gnf,fh->gnh", x, wp[t]) + bp[t][None]
        g_repr = jnp.sum(a * hv, axis=1)
        ctx = jnp.where(g_repr > 0.0, g_repr, jnp.exp(g_repr) - 1.0)
        r = jax.nn.sigmoid(ctx @ wih[t, 0] + bih[t, 0] + g_feats @ whh[t, 0] + bhh[t, 0])
        u = jax.nn.sigmoid(ctx @ wih[t, 1] + bih[t, 1] + g_feats @ whh[t, 1] + bhh[t, 1])
        n = jnp.tanh(ctx @ wih[t, 2] + bih[t, 2] + r * (g_feats @ whh[t, 2] + bhh[t, 2]))
        g_feats = (1.0 - u) * n + u * g_feats
    return g_feats


def init_params(key, feat_size, num_timesteps):
    """Synthetic parameters in reference layout.  Linear weights are stored
    PRE-TRANSPOSED (in_features, out_features); the (2F -> 1) logit layer is
    split into its graph-feature half and node-feature half."""
    F, T = feat_size, num_timesteps
    ks = jax.random.split(key, 9)
    s = 0.1
    wlg = s * jax.random.normal(ks[0], (T, 1, F), jnp.float32)
    wln = s * jax.random.normal(ks[1], (T, 1, F), jnp.float32)
    bl = s * jax.random.normal(ks[2], (T, 1, 1), jnp.float32)
    wp = s * jax.random.normal(ks[3], (T, F, F), jnp.float32)
    bp = s * jax.random.normal(ks[4], (T, 1, F), jnp.float32)
    wih = s * jax.random.normal(ks[5], (T, 3, F, F), jnp.float32)
    bih = s * jax.random.normal(ks[6], (T, 3, 1, F), jnp.float32)
    whh = s * jax.random.normal(ks[7], (T, 3, F, F), jnp.float32)
    bhh = s * jax.random.normal(ks[8], (T, 3, 1, F), jnp.float32)
    return (wlg, wln, bl, wp, bp, wih, bih, whh, bhh)


if __name__ == "__main__":
    G, N, F, T = 2, 8, 32, 2   # 2 graphs, up to 8 nodes each, feat_size=32, 2 timesteps

    key = jax.random.PRNGKey(0)
    k_nodes, k_params = jax.random.split(key)

    node_feats = jax.random.normal(k_nodes, (G, N, F), jnp.float32)
    # graph 0 has 8 valid nodes, graph 1 has 5 valid nodes (rest are padding)
    num_nodes = jnp.array([8, 5], dtype=jnp.int32)
    mask = (jnp.arange(N)[None, :] < num_nodes[:, None]).astype(jnp.float32)[..., None]

    params = init_params(k_params, F, T)

    out = jax.block_until_ready(attentive_fp_readout(node_feats, mask, params))
    ref = jax.block_until_ready(reference_readout(node_feats, mask, params))
    np.testing.assert_allclose(np.asarray(out), np.asarray(ref), rtol=2e-3, atol=2e-3)

    # TODO(synk): Dropout in project_nodes is omitted (module default dropout=0.0 / eval
    # mode), and only the graph features are returned (get_node_weight path not exposed).
    print("KERNEL_OK")
</pallas_src>

<mosaic_0001>
module attributes {stable_mosaic.version = 11 : i64} {
  func.func @readout_kernel(%arg0: i32, %arg1: memref<8x8x128xf32, #tpu.memory_space<vmem>>, %arg2: memref<8x1x1xi32, #tpu.memory_space<vmem>>, %arg3: memref<2x1x128xf32, #tpu.memory_space<vmem>>, %arg4: memref<128x2xf32, #tpu.memory_space<vmem>>, %arg5: memref<2x1x1xf32, #tpu.memory_space<vmem>>, %arg6: memref<2x128x128xf32, #tpu.memory_space<vmem>>, %arg7: memref<2x1x128xf32, #tpu.memory_space<vmem>>, %arg8: memref<2x256x256xf32, #tpu.memory_space<vmem>>, %arg9: memref<2x1x256xf32, #tpu.memory_space<vmem>>, %arg10: memref<2x128x128xf32, #tpu.memory_space<vmem>>, %arg11: memref<2x1x128xf32, #tpu.memory_space<vmem>>, %arg12: memref<2x128x128xf32, #tpu.memory_space<vmem>>, %arg13: memref<2x1x128xf32, #tpu.memory_space<vmem>>, %arg14: memref<8x128xf32, #tpu.memory_space<vmem>>) attributes {dimension_semantics = [#tpu.dimension_semantics<parallel>], iteration_bounds = array<i64: 1>, scalar_prefetch = 0 : i64, scratch_operands = 0 : i64, tpu.core_type = #tpu.core_type<tc>, window_params = [{transform_indices = @transform_0, window_bounds = array<i64: 8, 8, 128>}, {transform_indices = @transform_1, window_bounds = array<i64: 8, 1, 1>}, {pipeline_mode = #tpu.pipeline_mode<synchronous>, transform_indices = @transform_2, window_bounds = array<i64: 2, 1, 128>}, {pipeline_mode = #tpu.pipeline_mode<synchronous>, transform_indices = @transform_3, window_bounds = array<i64: 128, 2>}, {pipeline_mode = #tpu.pipeline_mode<synchronous>, transform_indices = @transform_4, window_bounds = array<i64: 2, 1, 1>}, {pipeline_mode = #tpu.pipeline_mode<synchronous>, transform_indices = @transform_5, window_bounds = array<i64: 2, 128, 128>}, {pipeline_mode = #tpu.pipeline_mode<synchronous>, transform_indices = @transform_6, window_bounds = array<i64: 2, 1, 128>}, {pipeline_mode = #tpu.pipeline_mode<synchronous>, transform_indices = @transform_7, window_bounds = array<i64: 2, 256, 256>}, {pipeline_mode = #tpu.pipeline_mode<synchronous>, transform_indices = @transform_8, window_bounds = array<i64: 2, 1, 256>}, {pipeline_mode = #tpu.pipeline_mode<synchronous>, transform_indices = @transform_9, window_bounds = array<i64: 2, 128, 128>}, {pipeline_mode = #tpu.pipeline_mode<synchronous>, transform_indices = @transform_10, window_bounds = array<i64: 2, 1, 128>}, {pipeline_mode = #tpu.pipeline_mode<synchronous>, transform_indices = @transform_11, window_bounds = array<i64: 2, 128, 128>}, {pipeline_mode = #tpu.pipeline_mode<synchronous>, transform_indices = @transform_12, window_bounds = array<i64: 2, 1, 128>}, {transform_indices = @transform_13, window_bounds = array<i64: 8, 128>}]} {
    %c0 = arith.constant 0 : index
    %c0_0 = arith.constant 0 : index
    %c0_1 = arith.constant 0 : index
    %0 = vector.load %arg1[%c0, %c0_0, %c0_1] : memref<8x8x128xf32, #tpu.memory_space<vmem>>, vector<8x8x128xf32>
    %1 = vector.shape_cast %0 : vector<8x8x128xf32> to vector<64x128xf32>
    %c0_2 = arith.constant 0 : index
    %c0_3 = arith.constant 0 : index
    %c0_4 = arith.constant 0 : index
    %2 = vector.load %arg2[%c0_2, %c0_3, %c0_4] : memref<8x1x1xi32, #tpu.memory_space<vmem>>, vector<8x1x1xi32>
    %3 = tpu.iota {dimensions = array<i32: 1>} : vector<8x8x1xi32>
    %4 = vector.broadcast %2 : vector<8x1x1xi32> to vector<8x8x1xi32>
    %5 = arith.cmpi slt, %3, %4 : vector<8x8x1xi32>
    %c0_5 = arith.constant 0 : index
    %c0_6 = arith.constant 0 : index
    %6 = vector.load %arg4[%c0_5, %c0_6] : memref<128x2xf32, #tpu.memory_space<vmem>>, vector<128x2xf32>
    %cst = arith.constant dense<0.000000e+00> : vector<64x2xf32>
    %7 = tpu.matmul %1, %6, %cst {dimension_numbers = #tpu.dot_dimension_numbers<[1], [0], [0], [1], [0, 0, 1, 1], [], []>} : vector<64x128xf32>, vector<128x2xf32>, vector<64x2xf32> -> vector<64x2xf32>
    %8 = vector.shape_cast %7 : vector<64x2xf32> to vector<8x8x2xf32>
    %cst_7 = arith.constant dense<0.000000e+00> : vector<8x128xf32>
    %9 = vector.multi_reduction <add>, %0, %cst_7 [1] : vector<8x8x128xf32> to vector<8x128xf32>
    %cst_8 = arith.constant 0.000000e+00 : f32
    %10 = vector.broadcast %cst_8 : f32 to vector<8x128xf32>
    %11 = arith.maximumf %9, %10 : vector<8x128xf32>
    %c0_9 = arith.constant 0 : index
    %c0_10 = arith.constant 0 : index
    %c0_11 = arith.constant 0 : index
    %12 = vector.load %arg3[%c0_9, %c0_10, %c0_11] : memref<2x1x128xf32, #tpu.memory_space<vmem>>, vector<1x1x128xf32>
    %13 = vector.shape_cast %12 : vector<1x1x128xf32> to vector<1x128xf32>
    %14 = vector.broadcast %13 : vector<1x128xf32> to vector<8x128xf32>
    %15 = arith.mulf %11, %14 : vector<8x128xf32>
    %cst_12 = arith.constant dense<0.000000e+00> : vector<8xf32>
    %16 = vector.multi_reduction <add>, %15, %cst_12 [1] : vector<8x128xf32> to vector<8xf32>
    %17 = vector.shape_cast %16 : vector<8xf32> to vector<8x1xf32>
    %18 = vector.shape_cast %17 : vector<8x1xf32> to vector<8x1x1xf32>
    %19 = vector.extract_strided_slice %8 {offsets = [0, 0, 0], sizes = [8, 8, 1], strides = [1, 1, 1]} : vector<8x8x2xf32> to vector<8x8x1xf32>
    %20 = vector.broadcast %18 : vector<8x1x1xf32> to vector<8x8x1xf32>
    %21 = arith.addf %20, %19 : vector<8x8x1xf32>
    %c0_13 = arith.constant 0 : index
    %c0_14 = arith.constant 0 : index
    %c0_15 = arith.constant 0 : index
    %22 = vector.load %arg5[%c0_13, %c0_14, %c0_15] : memref<2x1x1xf32, #tpu.memory_space<vmem>>, vector<1x1x1xf32>
    %23 = vector.shape_cast %22 : vector<1x1x1xf32> to vector<1x1xf32>
    %24 = vector.shape_cast %23 : vector<1x1xf32> to vector<1x1x1xf32>
    %25 = vector.broadcast %24 : vector<1x1x1xf32> to vector<8x8x1xf32>
    %26 = arith.addf %21, %25 : vector<8x8x1xf32>
    %cst_16 = arith.constant 0.000000e+00 : f32
    %27 = vector.broadcast %cst_16 : f32 to vector<8x8x1xf32>
    %28 = arith.cmpf oge, %26, %27 : vector<8x8x1xf32>
    %cst_17 = arith.constant 0.00999999977 : f32
    %29 = vector.broadcast %cst_17 : f32 to vector<8x8x1xf32>
    %30 = arith.mulf %29, %26 : vector<8x8x1xf32>
    %31 = arith.select %28, %26, %30 : vector<8x8x1xi1>, vector<8x8x1xf32>
    %cst_18 = arith.constant -1.000000e+30 : f32
    %32 = vector.broadcast %cst_18 : f32 to vector<8x8x1xf32>
    %33 = arith.select %5, %31, %32 : vector<8x8x1xi1>, vector<8x8x1xf32>
    %cst_19 = arith.constant dense<0xFF800000> : vector<8x1xf32>
    %34 = vector.multi_reduction <maximumf>, %33, %cst_19 [1] : vector<8x8x1xf32> to vector<8x1xf32>
    %35 = vector.shape_cast %34 : vector<8x1xf32> to vector<8x1x1xf32>
    %36 = vector.broadcast %35 : vector<8x1x1xf32> to vector<8x8x1xf32>
    %37 = arith.subf %33, %36 : vector<8x8x1xf32>
    %38 = math.exp %37 : vector<8x8x1xf32>
    %cst_20 = arith.constant 0.000000e+00 : f32
    %39 = vector.broadcast %cst_20 : f32 to vector<8x8x1xf32>
    %40 = arith.select %5, %38, %39 : vector<8x8x1xi1>, vector<8x8x1xf32>
    %cst_21 = arith.constant dense<0.000000e+00> : vector<8x1xf32>
    %41 = vector.multi_reduction <add>, %40, %cst_21 [1] : vector<8x8x1xf32> to vector<8x1xf32>
    %42 = vector.shape_cast %41 : vector<8x1xf32> to vector<8x1x1xf32>
    %cst_22 = arith.constant 9.99999968E-21 : f32
    %43 = vector.broadcast %cst_22 : f32 to vector<8x1x1xf32>
    %44 = arith.maximumf %42, %43 : vector<8x1x1xf32>
    %45 = tpu.reciprocal %44 {approx = true} : vector<8x1x1xf32> -> vector<8x1x1xf32>
    %46 = vector.broadcast %45 : vector<8x1x1xf32> to vector<8x8x1xf32>
    %47 = arith.mulf %40, %46 : vector<8x8x1xf32>
    %48 = vector.broadcast %47 : vector<8x8x1xf32> to vector<8x8x128xf32>
    %49 = arith.mulf %48, %0 : vector<8x8x128xf32>
    %cst_23 = arith.constant dense<0.000000e+00> : vector<8x128xf32>
    %50 = vector.multi_reduction <add>, %49, %cst_23 [1] : vector<8x8x128xf32> to vector<8x128xf32>
    %c0_24 = arith.constant 0 : index
    %c0_25 = arith.constant 0 : index
    %c0_26 = arith.constant 0 : index
    %51 = vector.load %arg6[%c0_24, %c0_25, %c0_26] : memref<2x128x128xf32, #tpu.memory_space<vmem>>, vector<1x128x128xf32>
    %52 = vector.shape_cast %51 : vector<1x128x128xf32> to vector<128x128xf32>
    %cst_27 = arith.constant dense<0.000000e+00> : vector<8x128xf32>
    %53 = tpu.matmul %50, %52, %cst_27 {dimension_numbers = #tpu.dot_dimension_numbers<[1], [0], [0], [1], [0, 0, 1, 1], [], []>} : vector<8x128xf32>, vector<128x128xf32>, vector<8x128xf32> -> vector<8x128xf32>
    %c0_28 = arith.constant 0 : index
    %c0_29 = arith.constant 0 : index
    %c0_30 = arith.constant 0 : index
    %54 = vector.load %arg7[%c0_28, %c0_29, %c0_30] : memref<2x1x128xf32, #tpu.memory_space<vmem>>, vector<1x1x128xf32>
    %55 = vector.shape_cast %54 : vector<1x1x128xf32> to vector<1x128xf32>
    %56 = vector.broadcast %55 : vector<1x128xf32> to vector<8x128xf32>
    %57 = arith.addf %53, %56 : vector<8x128xf32>
    %cst_31 = arith.constant 0.000000e+00 : f32
    %58 = vector.broadcast %cst_31 : f32 to vector<8x128xf32>
    %59 = arith.cmpf ogt, %57, %58 : vector<8x128xf32>
    %cst_32 = arith.constant 0.000000e+00 : f32
    %60 = vector.broadcast %cst_32 : f32 to vector<8x128xf32>
    %61 = arith.minimumf %57, %60 : vector<8x128xf32>
    %62 = math.exp %61 : vector<8x128xf32>
    %cst_33 = arith.constant 1.000000e+00 : f32
    %63 = vector.broadcast %cst_33 : f32 to vector<8x128xf32>
    %64 = arith.subf %62, %63 : vector<8x128xf32>
    %65 = arith.select %59, %57, %64 : vector<8x128xi1>, vector<8x128xf32>
    %66 = tpu.concatenate %65, %9 in 1 : vector<8x128xf32>, vector<8x128xf32> -> vector<8x256xf32>
    %c0_34 = arith.constant 0 : index
    %c0_35 = arith.constant 0 : index
    %c0_36 = arith.constant 0 : index
    %67 = vector.load %arg8[%c0_34, %c0_35, %c0_36] : memref<2x256x256xf32, #tpu.memory_space<vmem>>, vector<1x256x256xf32>
    %68 = vector.shape_cast %67 : vector<1x256x256xf32> to vector<256x256xf32>
    %cst_37 = arith.constant dense<0.000000e+00> : vector<8x256xf32>
    %69 = tpu.matmul %66, %68, %cst_37 {dimension_numbers = #tpu.dot_dimension_numbers<[1], [0], [0], [1], [0, 0, 1, 1], [], []>} : vector<8x256xf32>, vector<256x256xf32>, vector<8x256xf32> -> vector<8x256xf32>
    %c0_38 = arith.constant 0 : index
    %c0_39 = arith.constant 0 : index
    %c0_40 = arith.constant 0 : index
    %70 = vector.load %arg9[%c0_38, %c0_39, %c0_40] : memref<2x1x256xf32, #tpu.memory_space<vmem>>, vector<1x1x256xf32>
    %71 = vector.shape_cast %70 : vector<1x1x256xf32> to vector<1x256xf32>
    %72 = vector.broadcast %71 : vector<1x256xf32> to vector<8x256xf32>
    %73 = arith.addf %69, %72 : vector<8x256xf32>
    %74 = vector.extract_strided_slice %73 {offsets = [0, 0], sizes = [8, 128], strides = [1, 1]} : vector<8x256xf32> to vector<8x128xf32>
    %75 = arith.negf %74 : vector<8x128xf32>
    %76 = math.exp %75 : vector<8x128xf32>
    %cst_41 = arith.constant 1.000000e+00 : f32
    %77 = vector.broadcast %cst_41 : f32 to vector<8x128xf32>
    %78 = arith.addf %77, %76 : vector<8x128xf32>
    %79 = arith.divf %77, %78 : vector<8x128xf32>
    %80 = vector.extract_strided_slice %73 {offsets = [0, 128], sizes = [8, 128], strides = [1, 1]} : vector<8x256xf32> to vector<8x128xf32>
    %81 = arith.negf %80 : vector<8x128xf32>
    %82 = math.exp %81 : vector<8x128xf32>
    %cst_42 = arith.constant 1.000000e+00 : f32
    %83 = vector.broadcast %cst_42 : f32 to vector<8x128xf32>
    %84 = arith.addf %83, %82 : vector<8x128xf32>
    %85 = arith.divf %83, %84 : vector<8x128xf32>
    %c0_43 = arith.constant 0 : index
    %c0_44 = arith.constant 0 : index
    %c0_45 = arith.constant 0 : index
    %86 = vector.load %arg10[%c0_43, %c0_44, %c0_45] : memref<2x128x128xf32, #tpu.memory_space<vmem>>, vector<1x128x128xf32>
    %87 = vector.shape_cast %86 : vector<1x128x128xf32> to vector<128x128xf32>
    %cst_46 = arith.constant dense<0.000000e+00> : vector<8x128xf32>
    %88 = tpu.matmul %65, %87, %cst_46 {dimension_numbers = #tpu.dot_dimension_numbers<[1], [0], [0], [1], [0, 0, 1, 1], [], []>} : vector<8x128xf32>, vector<128x128xf32>, vector<8x128xf32> -> vector<8x128xf32>
    %c0_47 = arith.constant 0 : index
    %c0_48 = arith.constant 0 : index
    %c0_49 = arith.constant 0 : index
    %89 = vector.load %arg11[%c0_47, %c0_48, %c0_49] : memref<2x1x128xf32, #tpu.memory_space<vmem>>, vector<1x1x128xf32>
    %90 = vector.shape_cast %89 : vector<1x1x128xf32> to vector<1x128xf32>
    %91 = vector.broadcast %90 : vector<1x128xf32> to vector<8x128xf32>
    %92 = arith.addf %88, %91 : vector<8x128xf32>
    %c0_50 = arith.constant 0 : index
    %c0_51 = arith.constant 0 : index
    %c0_52 = arith.constant 0 : index
    %93 = vector.load %arg12[%c0_50, %c0_51, %c0_52] : memref<2x128x128xf32, #tpu.memory_space<vmem>>, vector<1x128x128xf32>
    %94 = vector.shape_cast %93 : vector<1x128x128xf32> to vector<128x128xf32>
    %cst_53 = arith.constant dense<0.000000e+00> : vector<8x128xf32>
    %95 = tpu.matmul %9, %94, %cst_53 {dimension_numbers = #tpu.dot_dimension_numbers<[1], [0], [0], [1], [0, 0, 1, 1], [], []>} : vector<8x128xf32>, vector<128x128xf32>, vector<8x128xf32> -> vector<8x128xf32>
    %c0_54 = arith.constant 0 : index
    %c0_55 = arith.constant 0 : index
    %c0_56 = arith.constant 0 : index
    %96 = vector.load %arg13[%c0_54, %c0_55, %c0_56] : memref<2x1x128xf32, #tpu.memory_space<vmem>>, vector<1x1x128xf32>
    %97 = vector.shape_cast %96 : vector<1x1x128xf32> to vector<1x128xf32>
    %98 = vector.broadcast %97 : vector<1x128xf32> to vector<8x128xf32>
    %99 = arith.addf %95, %98 : vector<8x128xf32>
    %100 = arith.mulf %79, %99 : vector<8x128xf32>
    %101 = arith.addf %92, %100 : vector<8x128xf32>
    %102 = math.tanh %101 : vector<8x128xf32>
    %cst_57 = arith.constant 1.000000e+00 : f32
    %103 = vector.broadcast %cst_57 : f32 to vector<8x128xf32>
    %104 = arith.subf %103, %85 : vector<8x128xf32>
    %105 = arith.mulf %104, %102 : vector<8x128xf32>
    %106 = arith.mulf %85, %9 : vector<8x128xf32>
    %107 = arith.addf %105, %106 : vector<8x128xf32>
    %cst_58 = arith.constant 0.000000e+00 : f32
    %108 = vector.broadcast %cst_58 : f32 to vector<8x128xf32>
    %109 = arith.maximumf %107, %108 : vector<8x128xf32>
    %c1 = arith.constant 1 : index
    %c0_59 = arith.constant 0 : index
    %c0_60 = arith.constant 0 : index
    %110 = vector.load %arg3[%c1, %c0_59, %c0_60] : memref<2x1x128xf32, #tpu.memory_space<vmem>>, vector<1x1x128xf32>
    %111 = vector.shape_cast %110 : vector<1x1x128xf32> to vector<1x128xf32>
    %112 = vector.broadcast %111 : vector<1x128xf32> to vector<8x128xf32>
    %113 = arith.mulf %109, %112 : vector<8x128xf32>
    %cst_61 = arith.constant dense<0.000000e+00> : vector<8xf32>
    %114 = vector.multi_reduction <add>, %113, %cst_61 [1] : vector<8x128xf32> to vector<8xf32>
    %115 = vector.shape_cast %114 : vector<8xf32> to vector<8x1xf32>
    %116 = vector.shape_cast %115 : vector<8x1xf32> to vector<8x1x1xf32>
    %117 = vector.extract_strided_slice %8 {offsets = [0, 0, 1], sizes = [8, 8, 1], strides = [1, 1, 1]} : vector<8x8x2xf32> to vector<8x8x1xf32>
    %118 = vector.broadcast %116 : vector<8x1x1xf32> to vector<8x8x1xf32>
    %119 = arith.addf %118, %117 : vector<8x8x1xf32>
    %c1_62 = arith.constant 1 : index
    %c0_63 = arith.constant 0 : index
    %c0_64 = arith.constant 0 : index
    %120 = vector.load %arg5[%c1_62, %c0_63, %c0_64] : memref<2x1x1xf32, #tpu.memory_space<vmem>>, vector<1x1x1xf32>
    %121 = vector.shape_cast %120 : vector<1x1x1xf32> to vector<1x1xf32>
    %122 = vector.shape_cast %121 : vector<1x1xf32> to vector<1x1x1xf32>
    %123 = vector.broadcast %122 : vector<1x1x1xf32> to vector<8x8x1xf32>
    %124 = arith.addf %119, %123 : vector<8x8x1xf32>
    %cst_65 = arith.constant 0.000000e+00 : f32
    %125 = vector.broadcast %cst_65 : f32 to vector<8x8x1xf32>
    %126 = arith.cmpf oge, %124, %125 : vector<8x8x1xf32>
    %cst_66 = arith.constant 0.00999999977 : f32
    %127 = vector.broadcast %cst_66 : f32 to vector<8x8x1xf32>
    %128 = arith.mulf %127, %124 : vector<8x8x1xf32>
    %129 = arith.select %126, %124, %128 : vector<8x8x1xi1>, vector<8x8x1xf32>
    %cst_67 = arith.constant -1.000000e+30 : f32
    %130 = vector.broadcast %cst_67 : f32 to vector<8x8x1xf32>
    %131 = arith.select %5, %129, %130 : vector<8x8x1xi1>, vector<8x8x1xf32>
    %cst_68 = arith.constant dense<0xFF800000> : vector<8x1xf32>
    %132 = vector.multi_reduction <maximumf>, %131, %cst_68 [1] : vector<8x8x1xf32> to vector<8x1xf32>
    %133 = vector.shape_cast %132 : vector<8x1xf32> to vector<8x1x1xf32>
    %134 = vector.broadcast %133 : vector<8x1x1xf32> to vector<8x8x1xf32>
    %135 = arith.subf %131, %134 : vector<8x8x1xf32>
    %136 = math.exp %135 : vector<8x8x1xf32>
    %cst_69 = arith.constant 0.000000e+00 : f32
    %137 = vector.broadcast %cst_69 : f32 to vector<8x8x1xf32>
    %138 = arith.select %5, %136, %137 : vector<8x8x1xi1>, vector<8x8x1xf32>
    %cst_70 = arith.constant dense<0.000000e+00> : vector<8x1xf32>
    %139 = vector.multi_reduction <add>, %138, %cst_70 [1] : vector<8x8x1xf32> to vector<8x1xf32>
    %140 = vector.shape_cast %139 : vector<8x1xf32> to vector<8x1x1xf32>
    %cst_71 = arith.constant 9.99999968E-21 : f32
    %141 = vector.broadcast %cst_71 : f32 to vector<8x1x1xf32>
    %142 = arith.maximumf %140, %141 : vector<8x1x1xf32>
    %143 = tpu.reciprocal %142 {approx = true} : vector<8x1x1xf32> -> vector<8x1x1xf32>
    %144 = vector.broadcast %143 : vector<8x1x1xf32> to vector<8x8x1xf32>
    %145 = arith.mulf %138, %144 : vector<8x8x1xf32>
    %146 = vector.broadcast %145 : vector<8x8x1xf32> to vector<8x8x128xf32>
    %147 = arith.mulf %146, %0 : vector<8x8x128xf32>
    %cst_72 = arith.constant dense<0.000000e+00> : vector<8x128xf32>
    %148 = vector.multi_reduction <add>, %147, %cst_72 [1] : vector<8x8x128xf32> to vector<8x128xf32>
    %c1_73 = arith.constant 1 : index
    %c0_74 = arith.constant 0 : index
    %c0_75 = arith.constant 0 : index
    %149 = vector.load %arg6[%c1_73, %c0_74, %c0_75] : memref<2x128x128xf32, #tpu.memory_space<vmem>>, vector<1x128x128xf32>
    %150 = vector.shape_cast %149 : vector<1x128x128xf32> to vector<128x128xf32>
    %cst_76 = arith.constant dense<0.000000e+00> : vector<8x128xf32>
    %151 = tpu.matmul %148, %150, %cst_76 {dimension_numbers = #tpu.dot_dimension_numbers<[1], [0], [0], [1], [0, 0, 1, 1], [], []>} : vector<8x128xf32>, vector<128x128xf32>, vector<8x128xf32> -> vector<8x128xf32>
    %c1_77 = arith.constant 1 : index
    %c0_78 = arith.constant 0 : index
    %c0_79 = arith.constant 0 : index
    %152 = vector.load %arg7[%c1_77, %c0_78, %c0_79] : memref<2x1x128xf32, #tpu.memory_space<vmem>>, vector<1x1x128xf32>
    %153 = vector.shape_cast %152 : vector<1x1x128xf32> to vector<1x128xf32>
    %154 = vector.broadcast %153 : vector<1x128xf32> to vector<8x128xf32>
    %155 = arith.addf %151, %154 : vector<8x128xf32>
    %cst_80 = arith.constant 0.000000e+00 : f32
    %156 = vector.broadcast %cst_80 : f32 to vector<8x128xf32>
    %157 = arith.cmpf ogt, %155, %156 : vector<8x128xf32>
    %cst_81 = arith.constant 0.000000e+00 : f32
    %158 = vector.broadcast %cst_81 : f32 to vector<8x128xf32>
    %159 = arith.minimumf %155, %158 : vector<8x128xf32>
    %160 = math.exp %159 : vector<8x128xf32>
    %cst_82 = arith.constant 1.000000e+00 : f32
    %161 = vector.broadcast %cst_82 : f32 to vector<8x128xf32>
    %162 = arith.subf %160, %161 : vector<8x128xf32>
    %163 = arith.select %157, %155, %162 : vector<8x128xi1>, vector<8x128xf32>
    %164 = tpu.concatenate %163, %107 in 1 : vector<8x128xf32>, vector<8x128xf32> -> vector<8x256xf32>
    %c1_83 = arith.constant 1 : index
    %c0_84 = arith.constant 0 : index
    %c0_85 = arith.constant 0 : index
    %165 = vector.load %arg8[%c1_83, %c0_84, %c0_85] : memref<2x256x256xf32, #tpu.memory_space<vmem>>, vector<1x256x256xf32>
    %166 = vector.shape_cast %165 : vector<1x256x256xf32> to vector<256x256xf32>
    %cst_86 = arith.constant dense<0.000000e+00> : vector<8x256xf32>
    %167 = tpu.matmul %164, %166, %cst_86 {dimension_numbers = #tpu.dot_dimension_numbers<[1], [0], [0], [1], [0, 0, 1, 1], [], []>} : vector<8x256xf32>, vector<256x256xf32>, vector<8x256xf32> -> vector<8x256xf32>
    %c1_87 = arith.constant 1 : index
    %c0_88 = arith.constant 0 : index
    %c0_89 = arith.constant 0 : index
    %168 = vector.load %arg9[%c1_87, %c0_88, %c0_89] : memref<2x1x256xf32, #tpu.memory_space<vmem>>, vector<1x1x256xf32>
    %169 = vector.shape_cast %168 : vector<1x1x256xf32> to vector<1x256xf32>
    %170 = vector.broadcast %169 : vector<1x256xf32> to vector<8x256xf32>
    %171 = arith.addf %167, %170 : vector<8x256xf32>
    %172 = vector.extract_strided_slice %171 {offsets = [0, 0], sizes = [8, 128], strides = [1, 1]} : vector<8x256xf32> to vector<8x128xf32>
    %173 = arith.negf %172 : vector<8x128xf32>
    %174 = math.exp %173 : vector<8x128xf32>
    %cst_90 = arith.constant 1.000000e+00 : f32
    %175 = vector.broadcast %cst_90 : f32 to vector<8x128xf32>
    %176 = arith.addf %175, %174 : vector<8x128xf32>
    %177 = arith.divf %175, %176 : vector<8x128xf32>
    %178 = vector.extract_strided_slice %171 {offsets = [0, 128], sizes = [8, 128], strides = [1, 1]} : vector<8x256xf32> to vector<8x128xf32>
    %179 = arith.negf %178 : vector<8x128xf32>
    %180 = math.exp %179 : vector<8x128xf32>
    %cst_91 = arith.constant 1.000000e+00 : f32
    %181 = vector.broadcast %cst_91 : f32 to vector<8x128xf32>
    %182 = arith.addf %181, %180 : vector<8x128xf32>
    %183 = arith.divf %181, %182 : vector<8x128xf32>
    %c1_92 = arith.constant 1 : index
    %c0_93 = arith.constant 0 : index
    %c0_94 = arith.constant 0 : index
    %184 = vector.load %arg10[%c1_92, %c0_93, %c0_94] : memref<2x128x128xf32, #tpu.memory_space<vmem>>, vector<1x128x128xf32>
    %185 = vector.shape_cast %184 : vector<1x128x128xf32> to vector<128x128xf32>
    %cst_95 = arith.constant dense<0.000000e+00> : vector<8x128xf32>
    %186 = tpu.matmul %163, %185, %cst_95 {dimension_numbers = #tpu.dot_dimension_numbers<[1], [0], [0], [1], [0, 0, 1, 1], [], []>} : vector<8x128xf32>, vector<128x128xf32>, vector<8x128xf32> -> vector<8x128xf32>
    %c1_96 = arith.constant 1 : index
    %c0_97 = arith.constant 0 : index
    %c0_98 = arith.constant 0 : index
    %187 = vector.load %arg11[%c1_96, %c0_97, %c0_98] : memref<2x1x128xf32, #tpu.memory_space<vmem>>, vector<1x1x128xf32>
    %188 = vector.shape_cast %187 : vector<1x1x128xf32> to vector<1x128xf32>
    %189 = vector.broadcast %188 : vector<1x128xf32> to vector<8x128xf32>
    %190 = arith.addf %186, %189 : vector<8x128xf32>
    %c1_99 = arith.constant 1 : index
    %c0_100 = arith.constant 0 : index
    %c0_101 = arith.constant 0 : index
    %191 = vector.load %arg12[%c1_99, %c0_100, %c0_101] : memref<2x128x128xf32, #tpu.memory_space<vmem>>, vector<1x128x128xf32>
    %192 = vector.shape_cast %191 : vector<1x128x128xf32> to vector<128x128xf32>
    %cst_102 = arith.constant dense<0.000000e+00> : vector<8x128xf32>
    %193 = tpu.matmul %107, %192, %cst_102 {dimension_numbers = #tpu.dot_dimension_numbers<[1], [0], [0], [1], [0, 0, 1, 1], [], []>} : vector<8x128xf32>, vector<128x128xf32>, vector<8x128xf32> -> vector<8x128xf32>
    %c1_103 = arith.constant 1 : index
    %c0_104 = arith.constant 0 : index
    %c0_105 = arith.constant 0 : index
    %194 = vector.load %arg13[%c1_103, %c0_104, %c0_105] : memref<2x1x128xf32, #tpu.memory_space<vmem>>, vector<1x1x128xf32>
    %195 = vector.shape_cast %194 : vector<1x1x128xf32> to vector<1x128xf32>
    %196 = vector.broadcast %195 : vector<1x128xf32> to vector<8x128xf32>
    %197 = arith.addf %193, %196 : vector<8x128xf32>
    %198 = arith.mulf %177, %197 : vector<8x128xf32>
    %199 = arith.addf %190, %198 : vector<8x128xf32>
    %200 = math.tanh %199 : vector<8x128xf32>
    %cst_106 = arith.constant 1.000000e+00 : f32
    %201 = vector.broadcast %cst_106 : f32 to vector<8x128xf32>
    %202 = arith.subf %201, %183 : vector<8x128xf32>
    %203 = arith.mulf %202, %200 : vector<8x128xf32>
    %204 = arith.mulf %183, %107 : vector<8x128xf32>
    %205 = arith.addf %203, %204 : vector<8x128xf32>
    %c0_107 = arith.constant 0 : index
    %c0_108 = arith.constant 0 : index
    %206 = vector.load %arg14[%c0_107, %c0_108] : memref<8x128xf32, #tpu.memory_space<vmem>>, vector<8x128xf32>
    tpu.vector_store %arg14[%c0_107, %c0_108], %205 {strides = array<i32>} : memref<8x128xf32, #tpu.memory_space<vmem>>, vector<8x128xf32>,
    return
  }
  func.func @transform_0(%arg0: i32) -> (i32, i32, i32) {
    %c0_i32 = arith.constant 0 : i32
    %c0_i32_0 = arith.constant 0 : i32
    %c0_i32_1 = arith.constant 0 : i32
    return %arg0, %c0_i32, %c0_i32_0 : i32, i32, i32
  }
  func.func @transform_1(%arg0: i32) -> (i32, i32, i32) {
    %c0_i32 = arith.constant 0 : i32
    %c0_i32_0 = arith.constant 0 : i32
    %c0_i32_1 = arith.constant 0 : i32
    return %arg0, %c0_i32, %c0_i32_0 : i32, i32, i32
  }
  func.func @transform_2(%arg0: i32) -> (i32, i32, i32) {
    %c0_i32 = arith.constant 0 : i32
    %c0_i32_0 = arith.constant 0 : i32
    %c0_i32_1 = arith.constant 0 : i32
    %c0_i32_2 = arith.constant 0 : i32
    return %c0_i32, %c0_i32_0, %c0_i32_1 : i32, i32, i32
  }
  func.func @transform_3(%arg0: i32) -> (i32, i32) {
    %c0_i32 = arith.constant 0 : i32
    %c0_i32_0 = arith.constant 0 : i32
    %c0_i32_1 = arith.constant 0 : i32
    return %c0_i32, %c0_i32_0 : i32, i32
  }
  func.func @transform_4(%arg0: i32) -> (i32, i32, i32) {
    %c0_i32 = arith.constant 0 : i32
    %c0_i32_0 = arith.constant 0 : i32
    %c0_i32_1 = arith.constant 0 : i32
    %c0_i32_2 = arith.constant 0 : i32
    return %c0_i32, %c0_i32_0, %c0_i32_1 : i32, i32, i32
  }
  func.func @transform_5(%arg0: i32) -> (i32, i32, i32) {
    %c0_i32 = arith.constant 0 : i32
    %c0_i32_0 = arith.constant 0 : i32
    %c0_i32_1 = arith.constant 0 : i32
    %c0_i32_2 = arith.constant 0 : i32
    return %c0_i32, %c0_i32_0, %c0_i32_1 : i32, i32, i32
  }
  func.func @transform_6(%arg0: i32) -> (i32, i32, i32) {
    %c0_i32 = arith.constant 0 : i32
    %c0_i32_0 = arith.constant 0 : i32
    %c0_i32_1 = arith.constant 0 : i32
    %c0_i32_2 = arith.constant 0 : i32
    return %c0_i32, %c0_i32_0, %c0_i32_1 : i32, i32, i32
  }
  func.func @transform_7(%arg0: i32) -> (i32, i32, i32) {
    %c0_i32 = arith.constant 0 : i32
    %c0_i32_0 = arith.constant 0 : i32
    %c0_i32_1 = arith.constant 0 : i32
    %c0_i32_2 = arith.constant 0 : i32
    return %c0_i32, %c0_i32_0, %c0_i32_1 : i32, i32, i32
  }
  func.func @transform_8(%arg0: i32) -> (i32, i32, i32) {
    %c0_i32 = arith.constant 0 : i32
    %c0_i32_0 = arith.constant 0 : i32
    %c0_i32_1 = arith.constant 0 : i32
    %c0_i32_2 = arith.constant 0 : i32
    return %c0_i32, %c0_i32_0, %c0_i32_1 : i32, i32, i32
  }
  func.func @transform_9(%arg0: i32) -> (i32, i32, i32) {
    %c0_i32 = arith.constant 0 : i32
    %c0_i32_0 = arith.constant 0 : i32
    %c0_i32_1 = arith.constant 0 : i32
    %c0_i32_2 = arith.constant 0 : i32
    return %c0_i32, %c0_i32_0, %c0_i32_1 : i32, i32, i32
  }
  func.func @transform_10(%arg0: i32) -> (i32, i32, i32) {
    %c0_i32 = arith.constant 0 : i32
    %c0_i32_0 = arith.constant 0 : i32
    %c0_i32_1 = arith.constant 0 : i32
    %c0_i32_2 = arith.constant 0 : i32
    return %c0_i32, %c0_i32_0, %c0_i32_1 : i32, i32, i32
  }
  func.func @transform_11(%arg0: i32) -> (i32, i32, i32) {
    %c0_i32 = arith.constant 0 : i32
    %c0_i32_0 = arith.constant 0 : i32
    %c0_i32_1 = arith.constant 0 : i32
    %c0_i32_2 = arith.constant 0 : i32
    return %c0_i32, %c0_i32_0, %c0_i32_1 : i32, i32, i32
  }
  func.func @transform_12(%arg0: i32) -> (i32, i32, i32) {
    %c0_i32 = arith.constant 0 : i32
    %c0_i32_0 = arith.constant 0 : i32
    %c0_i32_1 = arith.constant 0 : i32
    %c0_i32_2 = arith.constant 0 : i32
    return %c0_i32, %c0_i32_0, %c0_i32_1 : i32, i32, i32
  }
  func.func @transform_13(%arg0: i32) -> (i32, i32) {
    %c0_i32 = arith.constant 0 : i32
    %c0_i32_0 = arith.constant 0 : i32
    return %arg0, %c0_i32 : i32, i32
  }
}

</mosaic_0001>

<bundles_post_ra>
// kernel: tpu_custom_call.1
= control target key start
LH: loop header
LB: loop body
LE: loop exit
PB: predicated region body
PF: predicated region fallthrough
CT: control target
= control target key end

     0   :  { %18 = vsyncpa [#allocation3], 0  ;;  %s3922_s0 = inlined_call_operand.vmem [shape: f32[8,8,128], index: 0, kind: input, shape index: {}]   ;;  %s3923_s1 = inlined_call_operand.vmem [shape: s32[8,1,1], index: 1, kind: input, shape index: {}]   ;;  %s3924_s2 = inlined_call_operand.vmem [shape: f32[2,1,128], index: 2, kind: input, shape index: {}]   ;;  %s3925_s3 = inlined_call_operand.vmem [shape: f32[128,2], index: 3, kind: input, shape index: {}]   ;;  %s3926_s4 = inlined_call_operand.vmem [shape: f32[2,1,1], index: 4, kind: input, shape index: {}]   ;;  %s3927_s5 = inlined_call_operand.hbm [shape: f32[2,128,128], index: 5, kind: input, shape index: {}]   ;;  %s3928_s6 = inlined_call_operand.vmem [shape: f32[2,1,128], index: 6, kind: input, shape index: {}]   ;;  %s3929_s7 = inlined_call_operand.hbm [shape: f32[2,256,256], index: 7, kind: input, shape index: {}]   ;;  %s3930_s8 = inlined_call_operand.vmem [shape: f32[2,1,256], index: 8, kind: input, shape index: {}]   ;;  %s3931_s9 = inlined_call_operand.hbm [shape: f32[2,128,128], index: 9, kind: input, shape index: {}]   ;;  %s3932_s10 = inlined_call_operand.vmem [shape: f32[2,1,128], index: 10, kind: input, shape index: {}]   ;;  %s3933_s11 = inlined_call_operand.hbm [shape: f32[2,128,128], index: 11, kind: input, shape index: {}]   ;;  %s3934_s12 = inlined_call_operand.vmem [shape: f32[2,1,128], index: 12, kind: input, shape index: {}]   ;;  %s3935_s13 = inlined_call_operand.hbm [shape: f32[8,128], index: 13, kind: output, shape index: {}]  }
   0x1   :  { %19 = vsyncpa [#allocation6], 0 }
   0x2   :  { %20 = vsyncpa [#allocation9], 0 }
   0x3   :  { %21 = vsyncpa [#allocation4], 0  ;;  %s3079_s25 = smov [#allocation5]   ;;  %s2961_s29 = scalar_lea.hbm %s3929_s7, 16384 }
   0x4   :  { %s51_s26 = sshll.u32 %s3079_s25, 4  ;;  %p2962_p0 = scmp.ne.s32.totalorder %s3929_s7, %s2961_s29  ;;  %s52_s26 = int_to_ptr.vmem [resolvable:$true] %s51_s26 }
   0x5   :  { %p2965_p1 = scmp.lt.u32.totalorder %s2961_s29, %s3929_s7 }
   0x7   :  { %p2967_p2 = pnand %p2965_p1, %p2962_p0 }
   0x9   :  { %2970 = shalt.err (!%p2967_p2)
}
   0xa   :  { %s2971_s17 = scalar_lea.vmem %s52_s26, 16384  ;;  %p2976_p4 = scmp.lt.s32.totalorder %s52_s26, %s52_s26 }
   0xb   :  { %p2972_p3 = scmp.ne.s32.totalorder %s52_s26, %s2971_s17  ;;  %p2977_p5 = scmp.lt.s32.totalorder %s2971_s17, %s2971_s17 }
   0xd   :  { %p2978_p6 = por %p2977_p5, %p2976_p4 }
   0xf   :  { %p2979_p7 = pnand %p2978_p6, %p2972_p3 }
  0x11   :  { %2982 = shalt.err (!%p2979_p7)
}
  0x12   :  { %s3080_s18 = smov 256   ;;  %s3081_s19 = smov 16  }
  0x13   :  { %57 = dma.hbm_to_vmem [thread:$0]  %s3929_s7, 16384, %s52_s26, [#allocation6], %s3080_s18, %s3080_s18, %s3081_s19  }
  0x14   :  { %s3082_s22 = smov [#allocation2]   ;;  %s2983_s27 = scalar_lea.hbm %s3927_s5, 4096 }
  0x15   :  { %s37_s23 = sshll.u32 %s3082_s22, 4  ;;  %p2984_p8 = scmp.ne.s32.totalorder %s3927_s5, %s2983_s27  ;;  %s38_s23 = int_to_ptr.vmem [resolvable:$true] %s37_s23 }
  0x16   :  { %p2987_p9 = scmp.lt.u32.totalorder %s2983_s27, %s3927_s5 }
  0x18   :  { %p2989_p10 = pnand %p2987_p9, %p2984_p8 }
  0x1a   :  { %2992 = shalt.err (!%p2989_p10)
}
  0x1b   :  { %s2993_s15 = scalar_lea.vmem %s38_s23, 4096  ;;  %p2998_p12 = scmp.lt.s32.totalorder %s38_s23, %s38_s23 }
  0x1c   :  { %p2994_p11 = scmp.ne.s32.totalorder %s38_s23, %s2993_s15  ;;  %p2999_p13 = scmp.lt.s32.totalorder %s2993_s15, %s2993_s15 }
  0x1e   :  { %p3000_p0 = por %p2999_p13, %p2998_p12 }
  0x20   :  { %p3001_p1 = pnand %p3000_p0, %p2994_p11 }
  0x22   :  { %3004 = shalt.err (!%p3001_p1)
}
  0x23   :  { %s3083_s7 = smov 128   ;;  %s3084_s26 = smov 8  }
  0x24   :  { %43 = dma.hbm_to_vmem [thread:$0]  %s3927_s5, 4096, %s38_s23, [#allocation3], %s3083_s7, %s3083_s7, %s3084_s26  }
  0x25   :  { %s3085_s18 = smov [#allocation7]   ;;  %s3086_s20 = smov [#allocation8]  }
  0x26   :  { %s65_s19 = sshll.u32 %s3085_s18, 4  ;;  %s79_s21 = sshll.u32 %s3086_s20, 4  ;;  %s66_s19 = int_to_ptr.vmem [resolvable:$true] %s65_s19  ;;  %s3191_s21 = int_to_ptr.vmem [resolvable:$true] %s79_s21 }
  0x27   :  { %s3005_s25 = scalar_lea.hbm %s3931_s9, 4096 }
  0x28   :  { %p3006_p2 = scmp.ne.s32.totalorder %s3931_s9, %s3005_s25  ;;  %p3009_p3 = scmp.lt.u32.totalorder %s3005_s25, %s3931_s9 }
  0x2a   :  { %p3011_p4 = pnand %p3009_p3, %p3006_p2 }
  0x2c   :  { %3014 = shalt.err (!%p3011_p4)
}
  0x2d   :  { %s3015_s5 = scalar_lea.vmem %s66_s19, 4096  ;;  %p3020_p6 = scmp.lt.s32.totalorder %s66_s19, %s66_s19 }
  0x2e   :  { %p3016_p5 = scmp.ne.s32.totalorder %s66_s19, %s3015_s5  ;;  %p3021_p7 = scmp.lt.s32.totalorder %s3015_s5, %s3015_s5 }
  0x30   :  { %p3022_p8 = por %p3021_p7, %p3020_p6 }
  0x32   :  { %p3023_p9 = pnand %p3022_p8, %p3016_p5 }
  0x34   :  { %3026 = shalt.err (!%p3023_p9)
}
  0x35   :  { %71 = dma.hbm_to_vmem [thread:$0]  %s3931_s9, 4096, %s66_s19, [#allocation6], %s3083_s7, %s3083_s7, %s3084_s26  }
  0x36   :  { %s3027_s17 = scalar_lea.hbm %s3933_s11, 4096 }
  0x37   :  { %p3028_p10 = scmp.ne.s32.totalorder %s3933_s11, %s3027_s17  ;;  %p3031_p11 = scmp.lt.u32.totalorder %s3027_s17, %s3933_s11 }
  0x39   :  { %p3033_p12 = pnand %p3031_p11, %p3028_p10 }
  0x3b   :  { %3036 = shalt.err (!%p3033_p12)
}
  0x3c   :  { %s3037_s25 = scalar_lea.vmem %s3191_s21, 4096  ;;  %p3042_p0 = scmp.lt.s32.totalorder %s3191_s21, %s3191_s21 }
  0x3d   :  { %p3038_p13 = scmp.ne.s32.totalorder %s3191_s21, %s3037_s25  ;;  %p3043_p1 = scmp.lt.s32.totalorder %s3037_s25, %s3037_s25 }
  0x3f   :  { %p3044_p2 = por %p3043_p1, %p3042_p0 }
  0x41   :  { %p3045_p3 = pnand %p3044_p2, %p3038_p13 }
  0x43   :  { %3048 = shalt.err (!%p3045_p3)
}
  0x44   :  { %85 = dma.hbm_to_vmem [thread:$0]  %s3933_s11, 4096, %s3191_s21, [#allocation9], %s3083_s7, %s3083_s7, %s3084_s26  }
  0x45   :  { %3071 = dma.done.wait [#allocation3], 4096  }
  0x46   :  { %3072 = vsyncadd [#allocation3], 4294963200 }
  0x47   :  { %3073 = dma.done.wait [#allocation6], 20480  }
  0x48   :  { %3074 = vsyncadd [#allocation6], 4294946816 }
  0x49   :  { %3075 = dma.done.wait [#allocation9], 4096  }
  0x4a   :  { %3076 = vsyncadd [#allocation9], 4294963200  ;;  %v158_v0 = vld [vmem:[%s3925_s3] sm:$0xff]  ;;  %v159_v1 = vld [vmem:[%s3925_s3 + $0x8] sm:$0xff]  ;;  %vm359_vm0 = vcmask 1041409   ;;  %vm362_vm1 = vcmask 1042434  }
  0x4b   :  { %v160_v2 = vld [vmem:[%s3925_s3 + $0x10] sm:$0xff]  ;;  %v2536_v3 = vpack.c.bf16 %v159_v1, %v158_v0  ;;  %v161_v4 = vld [vmem:[%s3925_s3 + $0x18] sm:$0xff]  ;;  %v162_v5 = vld [vmem:[%s3925_s3 + $0x20] sm:$0xff]  ;;  %vm365_vm2 = vcmask 1043459   ;;  %vm368_vm3 = vcmask 1044484   ;;  %vm3938_vm4 = vcmask 1045509  }
  0x4c   :  { %v163_v6 = vld [vmem:[%s3925_s3 + $0x28] sm:$0xff]  ;;  %v2540_v7 = vpack.c.bf16 %v161_v4, %v160_v2  ;;  %v164_v8 = vld [vmem:[%s3925_s3 + $0x30] sm:$0xff]  ;;  %v165_v9 = vld [vmem:[%s3925_s3 + $0x38] sm:$0xff]  ;;  %vm3937_vm5 = vcmask 1046534   ;;  %vm3936_vm6 = vcmask 1047559   ;;  %vm478_vm8 = vcmask 7168  }
  0x4d   :  { %v166_v10 = vld [vmem:[%s3925_s3 + $0x40] sm:$0xff]  ;;  %2537 = vmatprep.subr.bf16.mxu0 %v2536_v3  ;;  %v167_v11 = vld [vmem:[%s3925_s3 + $0x48] sm:$0xff]  ;;  %v168_v12 = vld [vmem:[%s3925_s3 + $0x50] sm:$0xff]  ;;  %v2544_v16 = vpack.c.bf16 %v163_v6, %v162_v5  ;;  %v2548_v17 = vpack.c.bf16 %v165_v9, %v164_v8  ;;  %s3091_s28 = smov 1   ;;  %s3093_s23 = smov [#allocation10]  }
  0x4e   :  { %v169_v13 = vld [vmem:[%s3925_s3 + $0x58] sm:$0xff]  ;;  %2539 = vmatpush3.bf16.msra.mxu0 %v2536_v3  ;;  %v170_v14 = vld [vmem:[%s3925_s3 + $0x60] sm:$0xff]  ;;  %v171_v15 = vld [vmem:[%s3925_s3 + $0x68] sm:$0xff]  ;;  %v3278_v20 = vpack.c.bf16 %v167_v11, %v166_v10  ;;  %s2115_s11 = sshll.u32 %s3093_s23, 4  ;;  %s2116_s11 = int_to_ptr.vmem [resolvable:$true] %s2115_s11 }
  0x4f   :  { %2541 = vmatprep.subr.bf16.mxu0 %v2540_v7  ;;  %v100_v18 = vld [vmem:[%s3922_s0] sm:$0xff]  ;;  %v3276_v19 = vld [vmem:[%s3922_s0 + $0x8] sm:$0xff]  ;;  %v3280_v21 = vpack.c.bf16 %v169_v13, %v168_v12  ;;  %v3286_v24 = vld [vmem:[%s3922_s0 + $0x10] sm:$0xff]  ;;  %v3298_v27 = vpack.c.bf16 %v171_v15, %v170_v14  ;;  %p3054_p5 = scmp.lt.s32.totalorder %s2116_s11, %s2116_s11 }
  0x50   :  { %2314 = vmatprep.mubr.f32.mxu0 %v100_v18  ;;  %v279_v22 = vrot.slane %v100_v18, 4  ;;  %v285_v23 = vrot.slane %v3276_v19, 4  ;;  %v3291_v25 = vld [vmem:[%s3922_s0 + $0x18] sm:$0xff]  ;;  %v3296_v26 = vld [vmem:[%s3922_s0 + $0x20] sm:$0xff]  ;;  %v291_v28 = vrot.slane %v3286_v24, 4  ;;  %v3306_v31 = vld [vmem:[%s3922_s0 + $0x28] sm:$0xff] }
  0x51   :  { %v297_v29 = vrot.slane %v3291_v25, 4  ;;  %v303_v30 = vrot.slane %v3296_v26, 4  ;;  %v3311_v32 = vld [vmem:[%s3922_s0 + $0x30] sm:$0xff]  ;;  %v309_v35 = vrot.slane %v3306_v31, 4  ;;  %v3319_v37 = vld [vmem:[%s3922_s0 + $0x38] sm:$0xff] }
  0x52   :  { %2543 = vmatpush3.bf16.msra.mxu0 %v2540_v7  ;;  %v280_v33 = vadd.f32 %v279_v22, %v100_v18  ;;  %v286_v34 = vadd.f32 %v285_v23, %v3276_v19  ;;  %v315_v36 = vrot.slane %v3311_v32, 4  ;;  %v292_v38 = vadd.f32 %v291_v28, %v3286_v24  ;;  %v2134_v10 = vld [vmem:[%s3924_s2] ss:$0 sm:$0xff] }
  0x53   :  { %2545 = vmatprep.subr.bf16.mxu0 %v2544_v16  ;;  %v298_v39 = vadd.f32 %v297_v29, %v3291_v25  ;;  %v304_v40 = vadd.f32 %v303_v30, %v3296_v26  ;;  %v321_v41 = vrot.slane %v3319_v37, 4  ;;  %v310_v44 = vadd.f32 %v309_v35, %v3306_v31 }
  0x54   :  { %v281_v42 = vrot.slane %v280_v33, 2  ;;  %v287_v43 = vrot.slane %v286_v34, 2  ;;  %v316_v45 = vadd.f32 %v315_v36, %v3311_v32  ;;  %v293_v46 = vrot.slane %v292_v38, 2  ;;  %v172_v36 = vld [vmem:[%s3925_s3 + $0x70] sm:$0xff] }
  0x55   :  { %v299_v47 = vrot.slane %v298_v39, 2  ;;  %v305_v48 = vrot.slane %v304_v40, 2  ;;  %v322_v49 = vadd.f32 %v321_v41, %v3319_v37  ;;  %v311_v52 = vrot.slane %v310_v44, 2 }
  0x56   :  { %2547 = vmatpush3.bf16.msra.mxu0 %v2544_v16  ;;  %v282_v50 = vadd.f32 %v281_v42, %v280_v33  ;;  %v288_v51 = vadd.f32 %v287_v43, %v286_v34  ;;  %v317_v53 = vrot.slane %v316_v45, 2  ;;  %v294_v54 = vadd.f32 %v293_v46, %v292_v38 }
  0x57   :  { %2549 = vmatprep.subr.bf16.mxu0 %v2548_v17  ;;  %v300_v55 = vadd.f32 %v299_v47, %v298_v39  ;;  %v306_v56 = vadd.f32 %v305_v48, %v304_v40  ;;  %v323_v57 = vrot.slane %v322_v49, 2  ;;  %v312_v60 = vadd.f32 %v311_v52, %v310_v44 }
  0x58   :  { %v283_v58 = vrot.slane %v282_v50, 1  ;;  %v289_v59 = vrot.slane %v288_v51, 1  ;;  %v318_v61 = vadd.f32 %v317_v53, %v316_v45  ;;  %v295_v62 = vrot.slane %v294_v54, 1 }
  0x59   :  { %v301_v63 = vrot.slane %v300_v55, 1  ;;  %v307_v0 = vrot.slane %v306_v56, 1  ;;  %v324_v1 = vadd.f32 %v323_v57, %v322_v49  ;;  %v313_v4 = vrot.slane %v312_v60, 1  ;;  %v3397_v57 = vld [vmem:[%s3926_s4] ss:$0 sm:$0xff] }
  0x5a   :  { %2551 = vmatpush3.bf16.msra.mxu0 %v2548_v17  ;;  %v3328_v2 = vadd.f32 %v283_v58, %v282_v50  ;;  %v3330_v3 = vadd.f32 %v289_v59, %v288_v51  ;;  %v319_v5 = vrot.slane %v318_v61, 1  ;;  %v3333_v6 = vadd.f32 %v295_v62, %v294_v54 }
  0x5b   :  { %2553 = vmatprep.subr.bf16.mxu0 %v3278_v20  ;;  %v3335_v7 = vadd.f32 %v301_v63, %v300_v55  ;;  %v3337_v8 = vadd.f32 %v307_v0, %v306_v56  ;;  %v325_v9 = vrot.slane %v324_v1, 1  ;;  %v3344_v13 = vadd.f32 %v313_v4, %v312_v60 }
  0x5c   :  { %v327_v11 = vmax.f32 %v3328_v2, 0.0  ;;  %v328_v12 = vmax.f32 %v3330_v3, 0.0  ;;  %v3346_v14 = vadd.f32 %v319_v5, %v318_v61  ;;  %v329_v16 = vmax.f32 %v3333_v6, 0.0  ;;  %v3406_v61 = vld [vmem:[%s3923_s1 + $0x1] ss:$0 sm:$0xff] }
  0x5d   :  { %v3348_v15 = vadd.f32 %v325_v9, %v324_v1  ;;  %v330_v17 = vmax.f32 %v3335_v7, 0.0  ;;  %v331_v18 = vmax.f32 %v3337_v8, 0.0  ;;  %v332_v22 = vmax.f32 %v3344_v13, 0.0  ;;  %v3414_v1 = vld [vmem:[%s3923_s1] ss:$0 sm:$0xff] }
  0x5e   :  { %2555 = vmatpush3.bf16.msra.mxu0 %v3278_v20  ;;  %v333_v23 = vmax.f32 %v3346_v14, 0.0  ;;  %v342_v28 = vmul.f32 %v2134_v10, %v327_v11  ;;  %v343_v29 = vmul.f32 %v2134_v10, %v328_v12  ;;  %v344_v33 = vmul.f32 %v2134_v10, %v329_v16  ;;  %v173_v20 = vld [vmem:[%s3925_s3 + $0x78] sm:$0xff]  ;;  %v3424_v11 = vld [vmem:[%s3923_s1 + $0x3] ss:$0 sm:$0xff] }
  0x5f   :  { %2557 = vmatprep.subr.bf16.mxu0 %v3280_v21  ;;  %v334_v30 = vmax.f32 %v3348_v15, 0.0  ;;  %v345_v34 = vmul.f32 %v2134_v10, %v330_v17  ;;  %v346_v35 = vmul.f32 %v2134_v10, %v331_v18  ;;  %v347_v38 = vmul.f32 %v2134_v10, %v332_v22  ;;  %v3436_v18 = vld [vmem:[%s3923_s1 + $0x2] ss:$0 sm:$0xff] }
  0x60   :  { %v348_v39 = vmul.f32 %v2134_v10, %v333_v23  ;;  %v358_v40 = vrot.slane %v343_v29, 7  ;;  %v361_v42 = vrot.slane %v344_v33, 6  ;;  %v2564_v47 = vpack.c.bf16 %v173_v20, %v172_v36  ;;  %v3449_v33 = vld [vmem:[%s3923_s1 + $0x5] ss:$0 sm:$0xff] }
  0x61   :  { %v349_v41 = vmul.f32 %v2134_v10, %v334_v30  ;;  %v364_v43 = vrot.slane %v345_v34, 5  ;;  %v367_v44 = vrot.slane %v346_v35, 4  ;;  %v370_v46 = vrot.slane %v347_v38, 3  ;;  %v3461_v38 = vld [vmem:[%s3923_s1 + $0x4] ss:$0 sm:$0xff] }
  0x62   :  { %2559 = vmatpush3.bf16.msra.mxu0 %v3280_v21  ;;  %v360_v45 = vsel %vm359_vm0, %v358_v40, %v342_v28  ;;  %v373_v49 = vrot.slane %v348_v39, 2  ;;  %v116_v55 = vlaneseq }
  0x63   :  { %2561 = vmatprep.subr.bf16.mxu0 %v3298_v27  ;;  %v363_v48 = vsel %vm362_vm1, %v361_v42, %v360_v45  ;;  %v376_v51 = vrot.slane %v349_v41, 1 }
  0x64   :  { %v366_v50 = vsel %vm365_vm2, %v364_v43, %v363_v48  ;;  %v3381_v56 = vshrl.u32 %v116_v55, 7 }
  0x65   :  { %v369_v52 = vsel %vm368_vm3, %v367_v44, %v366_v50  ;;  %v3476_v44 = vld [vmem:[%s3923_s1 + $0x6] ss:$0 sm:$0xff] }
  0x66   :  { %2563 = vmatpush3.bf16.msra.mxu0 %v3298_v27  ;;  %v372_v21 = vsel %vm3938_vm4, %v370_v46, %v369_v52  ;;  %v3087_v27 = vmov 0   ;;  %v393_v58 = vsub.s32 2, %v3381_v56  ;;  %v405_v63 = vsub.s32 5, %v3381_v56 }
  0x67   :  { %2565 = vmatprep.subr.bf16.mxu0 %v2564_v47  ;;  %v375_v53 = vsel %vm3937_vm5, %v373_v49, %v372_v21  ;;  %2856 = vset.pattern.permute.xlu1 %v3087_v27  ;;  %v401_v0 = vsub.s32 4, %v3381_v56  ;;  %v3939_v9 = vsub.s32 7, %v3381_v56  ;;  %v3940_v10 = vsub.s32 6, %v3381_v56 }
  0x68   :  { %v378_v54 = vsel %vm3936_vm6, %v376_v51, %v375_v53  ;;  %2855 = vset.pattern.permute.xlu0 %v3087_v27  ;;  %vm151_vm7 = vcmp.lt.s32.totalorder %v3381_v56, %v3406_v61  ;;  %vm150_vm10 = vcmp.lt.s32.totalorder %v3381_v56, %v3414_v1  ;;  %vm153_vm12 = vcmp.lt.s32.totalorder %v3381_v56, %v3424_v11 }
  0x69   :  { %380 = vadd.xlane.f32.xlu0 %v378_v54  ;;  %vm152_vm13 = vcmp.lt.s32.totalorder %v3381_v56, %v3436_v18  ;;  %vm155_vm15 = vcmp.lt.s32.totalorder %v3381_v56, %v3449_v33 }
  0x6a   :  { %2567 = vmatpush3.bf16.msra.mxu0 %v2564_v47 }
  0x6d   :  { %2315 = vmatmul.mubr.f32.vlgmr.msra.gmra.mrb[0].mxu0 %v3276_v19  ;;  %v3384_v19 = vsub.s32 1, %v3381_v56 }
  0x6e   :  { %2317 = vmatprep.mubr.f32.mxu0 %v3286_v24 }
  0x71   :  { %2318 = vmatmul.mubr.f32.gmra.mrb[2].mxu0 %v3291_v25  ;;  %v3387_v25 = vsub.s32 0, %v3381_v56 }
  0x72   :  { %2320 = vmatprep.mubr.f32.mxu0 %v3296_v26 }
  0x75   :  { %2321 = vmatmul.mubr.f32.gmra.mrb[4].mxu0 %v3306_v31 }
  0x76   :  { %2323 = vmatprep.mubr.f32.mxu0 %v3311_v32  ;;  %v397_v32 = vsub.s32 3, %v3381_v56 }
  0x79   :  { %2324 = vmatmul.mubr.f32.gmra.mrb[6].mxu0 %v3319_v37 }
  0xf6   :  { %v381_v24 = vpop.xlane.xlu0 %380 }
  0xf7   :  { %v390_v26 = vrot.slane %v381_v24, %v3384_v19  ;;  %v386_v31 = vrot.slane %v381_v24, %v3387_v25  ;;  %v398_v5 = vrot.slane %v381_v24, %v397_v32  ;;  %v394_v17 = vrot.slane %v381_v24, %v393_v58 }
  0xf8   :  { %v406_v36 = vrot.slane %v381_v24, %v405_v63  ;;  %v402_v20 = vrot.slane %v381_v24, %v401_v0  ;;  %v414_v42 = vrot.slane %v381_v24, %v3939_v9  ;;  %v410_v53 = vrot.slane %v381_v24, %v3940_v10  ;;  %v3506_v24 = vld [vmem:[%s3923_s1 + $0x7] ss:$0 sm:$0xff] }
  0xf9   :  { %vm3941_vm5 = vcmp.lt.s32.totalorder %v3381_v56, %v3506_v24 }
 0x140   :  { %v3392_v37 = vpop.f32.mrb[0].mxu0 }
 0x141   :  { %v424_v59 = vadd.f32 %v3392_v37, %v390_v26  ;;  %v3401_v60 = vpop.f32.mrb[1].mxu0 }
 0x142   :  { %v423_v62 = vadd.f32 %v386_v31, %v3401_v60 }
 0x143   :  { %v439_v4 = vadd.f32 %v3397_v57, %v424_v59 }
 0x144   :  { %v438_v12 = vadd.f32 %v3397_v57, %v423_v62  ;;  %v3427_v16 = vpop.f32.mrb[2].mxu0 }
 0x145   :  { %vm447_vm9 = vcmp.ge.f32.partialorder %v439_v4, 0.0  ;;  %v455_v22 = vmul.f32 0.01, %v439_v4  ;;  %v426_v23 = vadd.f32 %v3427_v16, %v398_v5  ;;  %v3439_v28 = vpop.f32.mrb[3].mxu0 }
 0x146   :  { %vm446_vm11 = vcmp.ge.f32.partialorder %v438_v12, 0.0  ;;  %v454_v29 = vmul.f32 0.01, %v438_v12  ;;  %v425_v30 = vadd.f32 %v394_v17, %v3439_v28 }
 0x147   :  { %v463_v34 = vsel %vm447_vm9, %v439_v4, %v455_v22  ;;  %v441_v35 = vadd.f32 %v3397_v57, %v426_v23 }
 0x148   :  { %v462_v39 = vsel %vm446_vm11, %v438_v12, %v454_v29  ;;  %v440_v40 = vadd.f32 %v3397_v57, %v425_v30  ;;  %v3464_v41 = vpop.f32.mrb[4].mxu0  ;;  %v3471_v43 = vsel %vm151_vm7, %v463_v34, -1e+30  ;;  %vm154_vm11 = vcmp.lt.s32.totalorder %v3381_v56, %v3461_v38 }
 0x149   :  { %vm449_vm14 = vcmp.ge.f32.partialorder %v441_v35, 0.0  ;;  %v457_v45 = vmul.f32 0.01, %v441_v35  ;;  %v428_v46 = vadd.f32 %v3464_v41, %v406_v36  ;;  %v3479_v47 = vpop.f32.mrb[5].mxu0  ;;  %v486_v48 = vsel %vm478_vm8, %v3471_v43, -inf }
 0x14a   :  { %vm448_vm9 = vcmp.ge.f32.partialorder %v440_v40, 0.0  ;;  %v456_v49 = vmul.f32 0.01, %v440_v40  ;;  %v427_v50 = vadd.f32 %v402_v20, %v3479_v47  ;;  %v487_v51 = vrot.slane %v486_v48, 4 }
 0x14b   :  { %v465_v52 = vsel %vm449_vm14, %v441_v35, %v457_v45  ;;  %v443_v21 = vadd.f32 %v3397_v57, %v428_v46  ;;  %v3494_v54 = vsel %vm150_vm10, %v462_v39, -1e+30  ;;  %vm156_vm14 = vcmp.lt.s32.totalorder %v3381_v56, %v3476_v44 }
 0x14c   :  { %v464_v27 = vsel %vm448_vm9, %v440_v40, %v456_v49  ;;  %v442_v55 = vadd.f32 %v3397_v57, %v427_v50  ;;  %v3497_v26 = vpop.f32.mrb[6].mxu0  ;;  %v488_v31 = vmax.f32 %v486_v48, %v487_v51  ;;  %v479_v59 = vsel %vm478_vm8, %v3494_v54, -inf }
 0x14d   :  { %vm451_vm6 = vcmp.ge.f32.partialorder %v443_v21, 0.0  ;;  %v459_v62 = vmul.f32 0.01, %v443_v21  ;;  %v430_v4 = vadd.f32 %v3497_v26, %v414_v42  ;;  %v3509_v5 = vpop.f32.mrb[7].mxu0  ;;  %v480_v12 = vrot.slane %v479_v59, 4 }
 0x14e   :  { %vm450_vm9 = vcmp.ge.f32.partialorder %v442_v55, 0.0  ;;  %v458_v17 = vmul.f32 0.01, %v442_v55  ;;  %v429_v22 = vadd.f32 %v410_v53, %v3509_v5  ;;  %v489_v23 = vrot.slane %v488_v31, 2 }
 0x14f   :  { %v467_v29 = vsel %vm451_vm6, %v443_v21, %v459_v62  ;;  %v445_v30 = vadd.f32 %v3397_v57, %v430_v4  ;;  %v481_v34 = vmax.f32 %v479_v59, %v480_v12  ;;  %v473_v35 = vsel %vm153_vm12, %v465_v52, -1e+30 }
 0x150   :  { %v466_v36 = vsel %vm450_vm9, %v442_v55, %v458_v17  ;;  %v444_v20 = vadd.f32 %v3397_v57, %v429_v22  ;;  %v490_v39 = vmax.f32 %v488_v31, %v489_v23  ;;  %v500_v40 = vsel %vm478_vm8, %v473_v35, -inf }
 0x151   :  { %vm453_vm4 = vcmp.ge.f32.partialorder %v445_v30, 0.0  ;;  %v461_v42 = vmul.f32 0.01, %v445_v30  ;;  %v482_v45 = vrot.slane %v481_v34, 2  ;;  %v501_v46 = vrot.slane %v500_v40, 4 }
 0x152   :  { %vm452_vm6 = vcmp.ge.f32.partialorder %v444_v20, 0.0  ;;  %v460_v48 = vmul.f32 0.01, %v444_v20  ;;  %v491_v49 = vrot.slane %v490_v39, 1  ;;  %v472_v50 = vsel %vm152_vm13, %v464_v27, -1e+30 }
 0x153   :  { %v469_v51 = vsel %vm453_vm4, %v445_v30, %v461_v42  ;;  %v483_v52 = vmax.f32 %v481_v34, %v482_v45  ;;  %v502_v21 = vmax.f32 %v500_v40, %v501_v46  ;;  %v493_v53 = vsel %vm478_vm8, %v472_v50, -inf }
 0x154   :  { %v468_v57 = vsel %vm452_vm6, %v444_v20, %v460_v48  ;;  %v492_v55 = vmax.f32 %v490_v39, %v491_v49  ;;  %v494_v31 = vrot.slane %v493_v53, 4  ;;  %v475_v59 = vsel %vm155_vm15, %v467_v29, -1e+30 }
 0x155   :  { %v484_v62 = vrot.slane %v483_v52, 1  ;;  %v503_v4 = vrot.slane %v502_v21, 2  ;;  %v514_v12 = vsel %vm478_vm8, %v475_v59, -inf  ;;  %v474_v27 = vsel %vm154_vm11, %v466_v36, -1e+30 }
 0x156   :  { %v536_v17 = vsub.f32 %v3471_v43, %v492_v55  ;;  %v495_v22 = vmax.f32 %v493_v53, %v494_v31  ;;  %v515_v23 = vrot.slane %v514_v12, 4  ;;  %v507_v30 = vsel %vm478_vm8, %v474_v27, -inf }
 0x157   :  { %v485_v34 = vmax.f32 %v483_v52, %v484_v62  ;;  %v504_v20 = vmax.f32 %v502_v21, %v503_v4  ;;  %v508_v39 = vrot.slane %v507_v30, 4  ;;  %v476_v29 = vsel %vm156_vm14, %v468_v57, -1e+30 }
 0x158   :  { %v545_v40 = vmul.f32 1.442695, %v536_v17  ;;  %v496_v42 = vrot.slane %v495_v22, 2  ;;  %v516_v45 = vmax.f32 %v514_v12, %v515_v23  ;;  %v521_v46 = vsel %vm478_vm8, %v476_v29, -inf }
 0x159   :  { %v535_v36 = vsub.f32 %v3494_v54, %v485_v34  ;;  %v505_v48 = vrot.slane %v504_v20, 1  ;;  %v509_v43 = vmax.f32 %v507_v30, %v508_v39  ;;  %v522_v49 = vrot.slane %v521_v46, 4 }
 0x15a   :  { %2857 = vpow2.f32 %v545_v40  ;;  %v497_v53 = vmax.f32 %v495_v22, %v496_v42  ;;  %v517_v55 = vrot.slane %v516_v45, 2  ;;  %v477_v52 = vsel %vm3941_vm5, %v469_v51, -1e+30 }
 0x15b   :  { %v543_v21 = vmul.f32 1.442695, %v535_v36  ;;  %v506_v31 = vmax.f32 %v504_v20, %v505_v48  ;;  %v510_v57 = vrot.slane %v509_v43, 2  ;;  %v523_v62 = vmax.f32 %v521_v46, %v522_v49 }
 0x15c   :  { %v498_v4 = vrot.slane %v497_v53, 1  ;;  %v518_v12 = vmax.f32 %v516_v45, %v517_v55  ;;  %v528_v17 = vsel %vm478_vm8, %v477_v52, -inf  ;;  %vm3942_vm4 = vmmov 0  }
 0x15d   :  { %2859 = vpow2.f32 %v543_v21  ;;  %v538_v54 = vsub.f32 %v473_v35, %v506_v31  ;;  %v511_v23 = vmax.f32 %v509_v43, %v510_v57  ;;  %v524_v30 = vrot.slane %v523_v62, 2 }
 0x15e   :  { %v499_v34 = vmax.f32 %v497_v53, %v498_v4  ;;  %v519_v39 = vrot.slane %v518_v12, 1  ;;  %v529_v22 = vrot.slane %v528_v17, 4  ;;  %vm3944_vm9 = vcmask 1045509  }
 0x15f   :  { %v549_v40 = vmul.f32 1.442695, %v538_v54  ;;  %v512_v42 = vrot.slane %v511_v23, 1  ;;  %v525_v9 = vmax.f32 %v523_v62, %v524_v30  ;;  %vm3945_vm6 = vcmask 1046534  }
 0x160   :  { %v537_v10 = vsub.f32 %v472_v50, %v499_v34  ;;  %v520_v51 = vmax.f32 %v518_v12, %v519_v39  ;;  %v530_v36 = vmax.f32 %v528_v17, %v529_v22 }
 0x161   :  { %2861 = vpow2.f32 %v549_v40  ;;  %v513_v20 = vmax.f32 %v511_v23, %v512_v42  ;;  %v526_v46 = vrot.slane %v525_v9, 1 }
 0x162   :  { %v547_v48 = vmul.f32 1.442695, %v537_v10  ;;  %v540_v45 = vsub.f32 %v475_v59, %v520_v51  ;;  %v531_v49 = vrot.slane %v530_v36, 2 }
 0x163   :  { %v539_v55 = vsub.f32 %v474_v27, %v513_v20  ;;  %v527_v21 = vmax.f32 %v525_v9, %v526_v46 }
 0x164   :  { %v2858_v35 = vpop.eup %2857  ;;  %2863 = vpow2.f32 %v547_v48  ;;  %v553_v43 = vmul.f32 1.442695, %v540_v45  ;;  %v532_v53 = vmax.f32 %v530_v36, %v531_v49 }
 0x165   :  { %v3545_v31 = vsel %vm151_vm7, %v2858_v35, 0.0  ;;  %v551_v50 = vmul.f32 1.442695, %v539_v55  ;;  %v541_v57 = vsub.f32 %v476_v29, %v527_v21 }
 0x166   :  { %v574_v62 = vsel %vm478_vm8, %v3545_v31, 0.0  ;;  %2865 = vpow2.f32 %v553_v43  ;;  %v533_v10 = vrot.slane %v532_v53, 1 }
 0x167   :  { %v2860_v59 = vpop.eup %2859  ;;  %v575_v4 = vrot.slane %v574_v62, 4  ;;  %2867 = vpow2.f32 %v551_v50  ;;  %v555_v9 = vmul.f32 1.442695, %v541_v57 }
 0x168   :  { %v3552_v27 = vsel %vm150_vm10, %v2860_v59, 0.0  ;;  %v534_v12 = vmax.f32 %v532_v53, %v533_v10 }
 0x169   :  { %v576_v17 = vadd.f32 %v575_v4, %v574_v62  ;;  %v567_v54 = vsel %vm478_vm8, %v3552_v27, 0.0  ;;  %2869 = vpow2.f32 %v555_v9 }
 0x16a   :  { %v568_v29 = vrot.slane %v567_v54, 4  ;;  %v542_v23 = vsub.f32 %v477_v52, %v534_v12 }
 0x16b   :  { %v2862_v30 = vpop.eup %2861  ;;  %v577_v34 = vrot.slane %v576_v17, 2 }
 0x16c   :  { %v569_v39 = vadd.f32 %v568_v29, %v567_v54  ;;  %v3559_v22 = vsel %vm153_vm12, %v2862_v30, 0.0  ;;  %v557_v40 = vmul.f32 1.442695, %v542_v23 }
 0x16d   :  { %v578_v42 = vadd.f32 %v577_v34, %v576_v17  ;;  %v588_v51 = vsel %vm478_vm8, %v3559_v22, 0.0 }
 0x16e   :  { %v2864_v36 = vpop.eup %2863  ;;  %v570_v20 = vrot.slane %v569_v39, 2  ;;  %v589_v46 = vrot.slane %v588_v51, 4  ;;  %2871 = vpow2.f32 %v557_v40 }
 0x16f   :  { %v579_v48 = vrot.slane %v578_v42, 1  ;;  %v3566_v52 = vsel %vm152_vm13, %v2864_v36, 0.0 }
 0x170   :  { %v2866_v45 = vpop.eup %2865  ;;  %v571_v49 = vadd.f32 %v570_v20, %v569_v39  ;;  %v590_v55 = vadd.f32 %v589_v46, %v588_v51  ;;  %v581_v21 = vsel %vm478_vm8, %v3566_v52, 0.0 }
 0x171   :  { %v2868_v35 = vpop.eup %2867  ;;  %v580_v43 = vadd.f32 %v579_v48, %v578_v42  ;;  %v582_v53 = vrot.slane %v581_v21, 4  ;;  %v3573_v50 = vsel %vm155_vm15, %v2866_v45, 0.0 }
 0x172   :  { %v572_v57 = vrot.slane %v571_v49, 1  ;;  %v591_v62 = vrot.slane %v590_v55, 2  ;;  %v602_v10 = vsel %vm478_vm8, %v3573_v50, 0.0  ;;  %v3580_v59 = vsel %vm154_vm11, %v2868_v35, 0.0 }
 0x173   :  { %v2870_v4 = vpop.eup %2869  ;;  %v624_v9 = vmax.f32 %v580_v43, 1e-20  ;;  %v583_v12 = vadd.f32 %v582_v53, %v581_v21  ;;  %v603_v17 = vrot.slane %v602_v10, 4  ;;  %v595_v54 = vsel %vm478_vm8, %v3580_v59, 0.0 }
 0x174   :  { %v573_v29 = vadd.f32 %v572_v57, %v571_v49  ;;  %v592_v23 = vadd.f32 %v591_v62, %v590_v55  ;;  %v596_v30 = vrot.slane %v595_v54, 4  ;;  %v3587_v34 = vsel %vm156_vm14, %v2870_v4, 0.0 }
 0x175   :  { %2873 = vrcp.f32 %v624_v9  ;;  %v584_v39 = vrot.slane %v583_v12, 2  ;;  %v604_v40 = vadd.f32 %v603_v17, %v602_v10  ;;  %v609_v42 = vsel %vm478_vm8, %v3587_v34, 0.0 }
 0x176   :  { %v623_v51 = vmax.f32 %v573_v29, 1e-20  ;;  %v593_v36 = vrot.slane %v592_v23, 1  ;;  %v597_v20 = vadd.f32 %v596_v30, %v595_v54  ;;  %v610_v46 = vrot.slane %v609_v42, 4 }
 0x177   :  { %v585_v48 = vadd.f32 %v584_v39, %v583_v12  ;;  %v605_v45 = vrot.slane %v604_v40, 2 }
 0x178   :  { %v2872_v49 = vpop.eup %2871  ;;  %2875 = vrcp.f32 %v623_v51  ;;  %v594_v55 = vadd.f32 %v593_v36, %v592_v23  ;;  %v598_v21 = vrot.slane %v597_v20, 2  ;;  %v611_v35 = vadd.f32 %v610_v46, %v609_v42 }
 0x179   :  { %v586_v43 = vrot.slane %v585_v48, 1  ;;  %v606_v53 = vadd.f32 %v605_v45, %v604_v40  ;;  %v3594_v57 = vsel %vm3941_vm5, %v2872_v49, 0.0  ;;  %vm3946_vm5 = vcmask 1047559  }
 0x17a   :  { %v626_v62 = vmax.f32 %v594_v55, 1e-20  ;;  %v599_v10 = vadd.f32 %v598_v21, %v597_v20  ;;  %v612_v4 = vrot.slane %v611_v35, 2  ;;  %v616_v9 = vsel %vm478_vm8, %v3594_v57, 0.0 }
 0x17b   :  { %v587_v12 = vadd.f32 %v586_v43, %v585_v48  ;;  %v607_v17 = vrot.slane %v606_v53, 1  ;;  %v617_v54 = vrot.slane %v616_v9, 4 }
 0x17c   :  { %2877 = vrcp.f32 %v626_v62  ;;  %v600_v29 = vrot.slane %v599_v10, 1  ;;  %v613_v23 = vadd.f32 %v612_v4, %v611_v35 }
 0x17d   :  { %v625_v30 = vmax.f32 %v587_v12, 1e-20  ;;  %v608_v39 = vadd.f32 %v607_v17, %v606_v53  ;;  %v618_v40 = vadd.f32 %v617_v54, %v616_v9 }
 0x17e   :  { %v601_v42 = vadd.f32 %v600_v29, %v599_v10  ;;  %v614_v51 = vrot.slane %v613_v23, 1  ;;  %v744_v29 = vld [vmem:[#allocation2 + $0x8] sm:$0xff] }
 0x17f   :  { %v2874_v36 = vpop.eup %2873  ;;  %2879 = vrcp.f32 %v625_v30  ;;  %v628_v46 = vmax.f32 %v608_v39, 1e-20  ;;  %v619_v45 = vrot.slane %v618_v40, 2  ;;  %v3088_v39 = vmov 0.0|0.0  }
 0x180   :  { %v640_v20 = vmul.f32 %v2874_v36, %v3545_v31  ;;  %v627_v48 = vmax.f32 %v601_v42, 1e-20  ;;  %v615_v21 = vadd.f32 %v614_v51, %v613_v23  ;;  %2568 = vmatprep.subr.bf16.mxu1 %v3088_v39  ;;  %v747_v36 = vld [vmem:[#allocation2 + $0x20] sm:$0xff] }
 0x181   :  { %v620_v49 = vadd.f32 %v619_v45, %v618_v40  ;;  %2881 = vrcp.f32 %v628_v46  ;;  %v745_v40 = vld [vmem:[#allocation2 + $0x10] sm:$0xff]  ;;  %v748_v46 = vld [vmem:[#allocation2 + $0x28] sm:$0xff] }
 0x182   :  { %v2876_v55 = vpop.eup %2875  ;;  %654 = vperm.xlu1 %2856, %v640_v20   ;;  %2883 = vrcp.f32 %v627_v48  ;;  %v629_v62 = vmax.f32 %v615_v21, 1e-20  ;;  %v2575_v20 = vpack.c.bf16 %v748_v46, %v747_v36  ;;  %v752_v21 = vld [vmem:[#allocation2 + $0x48] sm:$0xff]  ;;  %v885_v46 = vld [vmem:[#allocation5 + $0x58] sm:$0xff] }
 0x183   :  { %v639_v43 = vmul.f32 %v2876_v55, %v3552_v27  ;;  %v621_v35 = vrot.slane %v620_v49, 1  ;;  %v743_v27 = vld [vmem:[#allocation2] sm:$0xff]  ;;  %v750_v55 = vld [vmem:[#allocation2 + $0x38] sm:$0xff]  ;;  %v883_v36 = vld [vmem:[#allocation5 + $0x48] sm:$0xff] }
 0x184   :  { %2885 = vrcp.f32 %v629_v62  ;;  %v2569_v30 = vpack.c.bf16 %v744_v29, %v743_v27  ;;  %v877_v27 = vld [vmem:[#allocation5 + $0x18] sm:$0xff]  ;;  %v874_v29 = vld [vmem:[#allocation5] sm:$0xff] }
 0x185   :  { %649 = vperm.xlu0 %2855, %v639_v43   ;;  %v622_v10 = vadd.f32 %v621_v35, %v620_v49  ;;  %v749_v49 = vld [vmem:[#allocation2 + $0x30] sm:$0xff] }
 0x186   :  { %v2878_v53 = vpop.eup %2877  ;;  %2570 = vmatpush3.bf16.msra.mxu1 %v2569_v30  ;;  %v2578_v48 = vpack.c.bf16 %v750_v55, %v749_v49  ;;  %v753_v35 = vld [vmem:[#allocation2 + $0x50] sm:$0xff]  ;;  %v887_v55 = vld [vmem:[#allocation5 + $0x68] sm:$0xff] }
 0x187   :  { %v642_v4 = vmul.f32 %v2878_v53, %v3559_v22  ;;  %v630_v31 = vmax.f32 %v622_v10, 1e-20  ;;  %2571 = vmatprep.subr.bf16.mxu1 %v3088_v39  ;;  %v754_v53 = vld [vmem:[#allocation2 + $0x58] sm:$0xff]  ;;  %v756_v10 = vld [vmem:[#allocation2 + $0x68] sm:$0xff]  ;;  %v876_v30 = vld [vmem:[#allocation5 + $0x10] sm:$0xff] }
 0x188   :  { %v2584_v62 = vpack.c.bf16 %v754_v53, %v753_v35  ;;  %v884_v49 = vld [vmem:[#allocation5 + $0x50] sm:$0xff]  ;;  %v891_v53 = vld [vmem:[#allocation5 + $0x88] sm:$0xff] }
 0x189   :  { %v2880_v9 = vpop.eup %2879  ;;  %664 = vperm.xlu1 %2856, %v642_v4   ;;  %2887 = vrcp.f32 %v630_v31  ;;  %v757_v4 = vld [vmem:[#allocation2 + $0x70] sm:$0xff]  ;;  %v758_v31 = vld [vmem:[#allocation2 + $0x78] sm:$0xff] }
 0x18a   :  { %v641_v12 = vmul.f32 %v2880_v9, %v3566_v52  ;;  %v746_v52 = vld [vmem:[#allocation2 + $0x18] sm:$0xff]  ;;  %v888_v35 = vld [vmem:[#allocation5 + $0x70] sm:$0xff] }
 0x18b   :  { %v2882_v17 = vpop.eup %2881  ;;  %v2572_v51 = vpack.c.bf16 %v746_v52, %v745_v40  ;;  %v881_v40 = vld [vmem:[#allocation5 + $0x38] sm:$0xff]  ;;  %v2594_v52 = vpack.c.bf16 %v876_v30, %v874_v29  ;;  %v894_v29 = vld [vmem:[#allocation5 + $0xa0] sm:$0xff]  ;;  %v899_v30 = vld [vmem:[#allocation5 + $0xc8] sm:$0xff] }
 0x18c   :  { %v644_v54 = vmul.f32 %v2882_v17, %v3573_v50  ;;  %v2884_v23 = vpop.eup %2883  ;;  %v2590_v17 = vpack.c.bf16 %v758_v31, %v757_v4  ;;  %v890_v4 = vld [vmem:[#allocation5 + $0x80] sm:$0xff]  ;;  %v895_v31 = vld [vmem:[#allocation5 + $0xa8] sm:$0xff] }
 0x18d   :  { %659 = vperm.xlu1 %2856, %v641_v12   ;;  %v643_v22 = vmul.f32 %v2884_v23, %v3580_v59  ;;  %2573 = vmatpush3.bf16.msra.mxu1 %v2572_v51  ;;  %v3090_v12 = vmov 0.0   ;;  %v878_v51 = vld [vmem:[#allocation5 + $0x20] sm:$0xff] }
 0x18e   :  { %v2886_v42 = vpop.eup %2885  ;;  %2574 = vmatprep.subr.bf16.mxu1 %v3088_v39  ;;  %2358 = vmatprep.mubr.msk.f32.mxu1 %vm3942_vm4, %v3090_v12 }
 0x18f   :  { %v645_v50 = vmul.f32 %v2886_v42, %v3587_v34  ;;  %v751_v34 = vld [vmem:[#allocation2 + $0x40] sm:$0xff] }
 0x190   :  { %v2581_v43 = vpack.c.bf16 %v752_v21, %v751_v34 }
 0x191   :  { %674 = vperm.xlu1 %2856, %v644_v54   ;;  %2576 = vmatpush3.bf16.msra.mxu1 %v2575_v20  ;;  %v875_v54 = vld [vmem:[#allocation5 + $0x8] sm:$0xff]  ;;  %v2600_v20 = vpack.c.bf16 %v885_v46, %v883_v36  ;;  %v905_v36 = vld [vmem:[#allocation5 + $0xf8] sm:$0xff] }
 0x192   :  { %2577 = vmatprep.subr.bf16.mxu1 %v3088_v39  ;;  %v2592_v23 = vpack.c.bf16 %v877_v27, %v875_v54 }
 0x193   :  { %v2888_v45 = vpop.eup %2887 }
 0x194   :  { %v646_v59 = vmul.f32 %v2888_v45, %v3594_v57  ;;  %v755_v57 = vld [vmem:[#allocation2 + $0x60] sm:$0xff]  ;;  %2593 = vmatprep.subr.bf16.mxu0 %v2592_v23  ;;  %v896_v23 = vld [vmem:[#allocation5 + $0xb0] sm:$0xff] }
 0x195   :  { %669 = vperm.xlu1 %2856, %v643_v22   ;;  %2579 = vmatpush3.bf16.msra.mxu1 %v2578_v48  ;;  %v2587_v9 = vpack.c.bf16 %v756_v10, %v755_v57  ;;  %v879_v22 = vld [vmem:[#allocation5 + $0x28] sm:$0xff]  ;;  %v889_v48 = vld [vmem:[#allocation5 + $0x78] sm:$0xff] }
 0x196   :  { %2580 = vmatprep.subr.bf16.mxu1 %v3088_v39  ;;  %v2596_v42 = vpack.c.bf16 %v881_v40, %v879_v22  ;;  %2595 = vmatpush1.bf16.msra.mxu0 %v2594_v52  ;;  %v2604_v21 = vpack.c.bf16 %v889_v48, %v887_v55  ;;  %v901_v22 = vld [vmem:[#allocation5 + $0xd8] sm:$0xff]  ;;  %v2614_v40 = vpack.c.bf16 %v896_v23, %v894_v29  ;;  %v916_v29 = vld [vmem:[#allocation5 + $0x150] sm:$0xff] }
 0x197   :  { %v2616_v52 = vpack.c.bf16 %v901_v22, %v899_v30  ;;  %v909_v55 = vld [vmem:[#allocation5 + $0x118] sm:$0xff]  ;;  %v2945_v22 = vld [vmem:[%s3922_s0 + $0x8] sm:$0xff] }
 0x198   :  { %2597 = vmatprep.subr.bf16.mxu0 %v2596_v42  ;;  %v898_v42 = vld [vmem:[#allocation5 + $0xc0] sm:$0xff] }
 0x199   :  { %679 = vperm.xlu1 %2856, %v645_v50   ;;  %2582 = vmatpush3.bf16.msra.mxu1 %v2581_v43  ;;  %v880_v50 = vld [vmem:[#allocation5 + $0x30] sm:$0xff]  ;;  %v886_v43 = vld [vmem:[#allocation5 + $0x60] sm:$0xff] }
 0x19a   :  { %2583 = vmatprep.subr.bf16.mxu1 %v3088_v39  ;;  %v2598_v45 = vpack.c.bf16 %v880_v50, %v878_v51  ;;  %v2606_v57 = vpack.c.bf16 %v888_v35, %v886_v43  ;;  %v900_v51 = vld [vmem:[#allocation5 + $0xd0] sm:$0xff]  ;;  %v903_v50 = vld [vmem:[#allocation5 + $0xe8] sm:$0xff] }
 0x19b   :  { %v2618_v46 = vpack.c.bf16 %v900_v51, %v898_v42  ;;  %v908_v43 = vld [vmem:[#allocation5 + $0x110] sm:$0xff]  ;;  %v911_v35 = vld [vmem:[#allocation5 + $0x128] sm:$0xff]  ;;  %v2946_v42 = vld [vmem:[%s3922_s0] sm:$0xff] }
 0x19c   :  { %2599 = vmatpush1.bf16.msra.mxu0 %v2598_v45  ;;  %v2620_v45 = vpack.c.bf16 %v905_v36, %v903_v50 }
 0x19d   :  { %684 = vperm.xlu1 %2856, %v646_v59   ;;  %2585 = vmatpush3.bf16.msra.mxu1 %v2584_v62  ;;  %v882_v59 = vld [vmem:[#allocation5 + $0x40] sm:$0xff]  ;;  %v893_v62 = vld [vmem:[#allocation5 + $0x98] sm:$0xff] }
 0x19e   :  { %2586 = vmatprep.subr.bf16.mxu1 %v3088_v39  ;;  %v2602_v34 = vpack.c.bf16 %v884_v49, %v882_v59  ;;  %2601 = vmatprep.subr.bf16.mxu0 %v2600_v20  ;;  %v2608_v10 = vpack.c.bf16 %v893_v62, %v891_v53  ;;  %v902_v20 = vld [vmem:[#allocation5 + $0xe0] sm:$0xff]  ;;  %v904_v59 = vld [vmem:[#allocation5 + $0xf0] sm:$0xff]  ;;  %v907_v49 = vld [vmem:[#allocation5 + $0x108] sm:$0xff] }
 0x19f   :  { %v2622_v48 = vpack.c.bf16 %v904_v59, %v902_v20  ;;  %v913_v53 = vld [vmem:[#allocation5 + $0x138] sm:$0xff] }
 0x1a0   :  { %2603 = vmatpush1.bf16.msra.mxu0 %v2602_v34  ;;  %v2624_v34 = vpack.c.bf16 %v909_v55, %v907_v49 }
 0x1a1   :  { %2588 = vmatpush3.bf16.msra.mxu1 %v2587_v9  ;;  %2605 = vmatprep.subr.bf16.mxu0 %v2604_v21  ;;  %v892_v9 = vld [vmem:[#allocation5 + $0x90] sm:$0xff]  ;;  %v906_v21 = vld [vmem:[#allocation5 + $0x100] sm:$0xff] }
 0x1a2   :  { %2589 = vmatprep.subr.bf16.mxu1 %v3088_v39  ;;  %v2610_v54 = vpack.c.bf16 %v892_v9, %v890_v4  ;;  %v2626_v62 = vpack.c.bf16 %v908_v43, %v906_v21  ;;  %v912_v4 = vld [vmem:[#allocation5 + $0x130] sm:$0xff]  ;;  %v915_v9 = vld [vmem:[#allocation5 + $0x148] sm:$0xff] }
 0x1a4   :  { %2607 = vmatpush1.bf16.msra.mxu0 %v2606_v57  ;;  %v2628_v57 = vpack.c.bf16 %v913_v53, %v911_v35 }
 0x1a5   :  { %2591 = vmatpush3.bf16.msra.mxu1 %v2590_v17  ;;  %v897_v17 = vld [vmem:[#allocation5 + $0xb8] sm:$0xff]  ;;  %2609 = vmatprep.subr.bf16.mxu0 %v2608_v10  ;;  %v910_v10 = vld [vmem:[#allocation5 + $0x120] sm:$0xff] }
 0x1a6   :  { %2656 = vmatprep.subr.bf16.mxu1 %v3088_v39  ;;  %v2612_v27 = vpack.c.bf16 %v897_v17, %v895_v31  ;;  %v917_v31 = vld [vmem:[#allocation5 + $0x158] sm:$0xff]  ;;  %v2630_v17 = vpack.c.bf16 %v912_v4, %v910_v10  ;;  %v2949_v10 = vld [vmem:[%s3922_s0 + $0x28] sm:$0xff] }
 0x1a8   :  { %2611 = vmatpush1.bf16.msra.mxu0 %v2610_v54  ;;  %v2632_v54 = vpack.c.bf16 %v917_v31, %v915_v9 }
 0x1a9   :  { %2613 = vmatprep.subr.bf16.mxu0 %v2612_v27  ;;  %v914_v27 = vld [vmem:[#allocation5 + $0x140] sm:$0xff] }
 0x1aa   :  { %v2634_v23 = vpack.c.bf16 %v916_v29, %v914_v27 }
 0x1ac   :  { %2615 = vmatpush1.bf16.msra.mxu0 %v2614_v40 }
 0x1ad   :  { %2617 = vmatprep.subr.bf16.mxu0 %v2616_v52 }
 0x1b0   :  { %2619 = vmatpush1.bf16.msra.mxu0 %v2618_v46 }
 0x1b1   :  { %2621 = vmatprep.subr.bf16.mxu0 %v2620_v45  ;;  %v2947_v45 = vld [vmem:[%s3922_s0 + $0x18] sm:$0xff] }
 0x1b4   :  { %2623 = vmatpush1.bf16.msra.mxu0 %v2622_v48  ;;  %v2948_v48 = vld [vmem:[%s3922_s0 + $0x10] sm:$0xff] }
 0x1b5   :  { %2625 = vmatprep.subr.bf16.mxu0 %v2624_v34 }
 0x1b8   :  { %2627 = vmatpush1.bf16.msra.mxu0 %v2626_v62 }
 0x1b9   :  { %2629 = vmatprep.subr.bf16.mxu0 %v2628_v57 }
 0x1bc   :  { %2631 = vmatpush1.bf16.msra.mxu0 %v2630_v17 }
 0x1bd   :  { %2633 = vmatprep.subr.bf16.mxu0 %v2632_v54 }
 0x1c0   :  { %2635 = vmatpush1.bf16.msra.mxu0 %v2634_v23  ;;  %v2950_v23 = vld [vmem:[%s3922_s0 + $0x20] sm:$0xff] }
 0x201   :  { %v655_v30 = vpop.permute.xlu1 %654 }
 0x202   :  { %v688_v40 = vmul.f32 %v2945_v22, %v655_v30 }
 0x204   :  { %v650_v52 = vpop.permute.xlu0 %649  ;;  %v701_v50 = vrot.slane %v688_v40, 4 }
 0x205   :  { %v687_v51 = vmul.f32 %v2946_v42, %v650_v52 }
 0x206   :  { %v702_v59 = vadd.f32 %v701_v50, %v688_v40 }
 0x207   :  { %v695_v46 = vrot.slane %v687_v51, 4 }
 0x208   :  { %v665_v36 = vpop.permute.xlu1 %664  ;;  %v703_v35 = vrot.slane %v702_v59, 2 }
 0x209   :  { %v690_v20 = vmul.f32 %v2947_v45, %v665_v36  ;;  %v696_v55 = vadd.f32 %v695_v46, %v687_v51  ;;  %v2951_v45 = vld [vmem:[%s3922_s0 + $0x30] sm:$0xff] }
 0x20a   :  { %v704_v54 = vadd.f32 %v703_v35, %v702_v59 }
 0x20b   :  { %v713_v21 = vrot.slane %v690_v20, 4  ;;  %v697_v62 = vrot.slane %v696_v55, 2 }
 0x20c   :  { %v660_v49 = vpop.permute.xlu1 %659  ;;  %v705_v51 = vrot.slane %v704_v54, 1 }
 0x20d   :  { %v689_v34 = vmul.f32 %v2948_v48, %v660_v49  ;;  %v714_v9 = vadd.f32 %v713_v21, %v690_v20  ;;  %v698_v29 = vadd.f32 %v697_v62, %v696_v55 }
 0x20e   :  { %v706_v21 = vadd.f32 %v705_v51, %v704_v54 }
 0x20f   :  { %v707_v43 = vrot.slane %v689_v34, 4  ;;  %v715_v22 = vrot.slane %v714_v9, 2  ;;  %v699_v36 = vrot.slane %v698_v29, 1 }
 0x210   :  { %v675_v53 = vpop.permute.xlu1 %674 }
 0x211   :  { %v708_v57 = vadd.f32 %v707_v43, %v689_v34  ;;  %v692_v4 = vmul.f32 %v2949_v10, %v675_v53  ;;  %v716_v59 = vadd.f32 %v715_v22, %v714_v9  ;;  %v700_v35 = vadd.f32 %v699_v36, %v698_v29 }
 0x213   :  { %v709_v31 = vrot.slane %v708_v57, 2  ;;  %v725_v17 = vrot.slane %v692_v4, 4 }
 0x214   :  { %v670_v27 = vpop.permute.xlu1 %669 }
 0x215   :  { %v691_v30 = vmul.f32 %v2950_v23, %v670_v27  ;;  %v710_v40 = vadd.f32 %v709_v31, %v708_v57  ;;  %v726_v52 = vadd.f32 %v725_v17, %v692_v4  ;;  %v2952_v57 = vld [vmem:[%s3922_s0 + $0x38] sm:$0xff]  ;;  %v717_v4 = vrot.slane %v716_v59, 1 }
 0x217   :  { %v719_v42 = vrot.slane %v691_v30, 4  ;;  %v711_v49 = vrot.slane %v710_v40, 1  ;;  %v727_v55 = vrot.slane %v726_v52, 2  ;;  %v718_v51 = vadd.f32 %v717_v4, %v716_v59  ;;  %v1035_v59 = vld [vmem:[#allocation7 + $0x10] sm:$0xff]  ;;  %v1037_v4 = vld [vmem:[#allocation7 + $0x20] sm:$0xff] }
 0x218   :  { %v680_v50 = vpop.permute.xlu1 %679 }
 0x219   :  { %v720_v46 = vadd.f32 %v719_v42, %v691_v30  ;;  %v693_v20 = vmul.f32 %v2951_v45, %v680_v50  ;;  %v712_v31 = vadd.f32 %v711_v49, %v710_v40  ;;  %v728_v17 = vadd.f32 %v727_v55, %v726_v52  ;;  %v1033_v52 = vld [vmem:[#allocation7] sm:$0xff]  ;;  %v1034_v49 = vld [vmem:[#allocation7 + $0x8] sm:$0xff] }
 0x21a   :  { %v774_v30 = vsel %vm359_vm0, %v706_v21, %v700_v35  ;;  %v2657_v35 = vpack.c.bf16 %v1034_v49, %v1033_v52 }
 0x21b   :  { %v721_v48 = vrot.slane %v720_v46, 2  ;;  %v731_v34 = vrot.slane %v693_v20, 4  ;;  %v775_v54 = vsel %vm362_vm1, %v712_v31, %v774_v30  ;;  %v729_v50 = vrot.slane %v728_v17, 1  ;;  %v1038_v31 = vld [vmem:[#allocation7 + $0x28] sm:$0xff] }
 0x21c   :  { %v685_v43 = vpop.permute.xlu1 %684 }
 0x21d   :  { %v722_v53 = vadd.f32 %v721_v48, %v720_v46  ;;  %v732_v62 = vadd.f32 %v731_v34, %v693_v20  ;;  %v694_v10 = vmul.f32 %v2952_v57, %v685_v43  ;;  %v776_v20 = vsel %vm365_vm2, %v718_v51, %v775_v54  ;;  %v920_v54 = vld [vmem:[#allocation5 + $0x170] sm:$0xff] }
 0x21e   :  { %v730_v55 = vadd.f32 %v729_v50, %v728_v17  ;;  %v2663_v17 = vpack.c.bf16 %v1038_v31, %v1037_v4  ;;  %v923_v50 = vld [vmem:[#allocation5 + $0x188] sm:$0xff]  ;;  %v933_v4 = vld [vmem:[#allocation5 + $0x1d8] sm:$0xff]  ;;  %v1045_v31 = vld [vmem:[#allocation7 + $0x60] sm:$0xff] }
 0x21f   :  { %v723_v27 = vrot.slane %v722_v53, 1  ;;  %v733_v23 = vrot.slane %v732_v62, 2  ;;  %v737_v9 = vrot.slane %v694_v10, 4 }
 0x221   :  { %v734_v22 = vadd.f32 %v733_v23, %v732_v62  ;;  %v738_v42 = vadd.f32 %v737_v9, %v694_v10  ;;  %v724_v29 = vadd.f32 %v723_v27, %v722_v53  ;;  %v1036_v62 = vld [vmem:[#allocation7 + $0x18] sm:$0xff]  ;;  %v919_v27 = vld [vmem:[#allocation5 + $0x168] sm:$0xff]  ;;  %v1039_v9 = vld [vmem:[#allocation7 + $0x30] sm:$0xff] }
 0x222   :  { %v2660_v10 = vpack.c.bf16 %v1036_v62, %v1035_v59  ;;  %v921_v23 = vld [vmem:[#allocation5 + $0x178] sm:$0xff]  ;;  %v928_v59 = vld [vmem:[#allocation5 + $0x1b0] sm:$0xff] }
 0x223   :  { %v735_v36 = vrot.slane %v734_v22, 1  ;;  %v739_v46 = vrot.slane %v738_v42, 2  ;;  %v777_v40 = vsel %vm368_vm3, %v724_v29, %v776_v20  ;;  %v2636_v30 = vpack.c.bf16 %v921_v23, %v919_v27  ;;  %v1042_v20 = vld [vmem:[#allocation7 + $0x48] sm:$0xff]  ;;  %v930_v23 = vld [vmem:[#allocation5 + $0x1c0] sm:$0xff] }
 0x224   :  { %v778_v43 = vsel %vm3944_vm9, %v730_v55, %v777_v40  ;;  %v924_v40 = vld [vmem:[#allocation5 + $0x190] sm:$0xff]  ;;  %v927_v55 = vld [vmem:[#allocation5 + $0x1a8] sm:$0xff] }
 0x225   :  { %v740_v45 = vadd.f32 %v739_v46, %v738_v42  ;;  %v736_v48 = vadd.f32 %v735_v36, %v734_v22  ;;  %v1040_v22 = vld [vmem:[#allocation7 + $0x38] sm:$0xff]  ;;  %v918_v42 = vld [vmem:[#allocation5 + $0x160] sm:$0xff]  ;;  %2637 = vmatprep.subr.bf16.mxu0 %v2636_v30  ;;  %v1046_v27 = vld [vmem:[#allocation7 + $0x68] sm:$0xff] }
 0x226   :  { %v2666_v29 = vpack.c.bf16 %v1040_v22, %v1039_v9  ;;  %v2638_v51 = vpack.c.bf16 %v920_v54, %v918_v42  ;;  %v925_v36 = vld [vmem:[#allocation5 + $0x198] sm:$0xff]  ;;  %v1041_v46 = vld [vmem:[#allocation7 + $0x40] sm:$0xff]  ;;  %v932_v9 = vld [vmem:[#allocation5 + $0x1d0] sm:$0xff]  ;;  %v2675_v30 = vpack.c.bf16 %v1046_v27, %v1045_v31  ;;  %v866_v42 = vsel %vm359_vm0, %v3330_v3, %v3328_v2 }
 0x227   :  { %v741_v34 = vrot.slane %v740_v45, 1  ;;  %v779_v53 = vsel %vm3945_vm6, %v736_v48, %v778_v43  ;;  %v922_v48 = vld [vmem:[#allocation5 + $0x180] sm:$0xff]  ;;  %v2669_v52 = vpack.c.bf16 %v1042_v20, %v1041_v46  ;;  %v2650_v22 = vpack.c.bf16 %v932_v9, %v930_v23  ;;  %v935_v54 = vld [vmem:[#allocation5 + $0x1e8] sm:$0xff]  ;;  %v1048_v46 = vld [vmem:[#allocation7 + $0x78] sm:$0xff] }
 0x228   :  { %2639 = vmatpush1.bf16.msra.mxu0 %v2638_v51  ;;  %v2642_v49 = vpack.c.bf16 %v924_v40, %v922_v48  ;;  %v1047_v51 = vld [vmem:[#allocation7 + $0x70] sm:$0xff]  ;;  %v1131_v31 = vld [vmem:[#allocation8 + $0x28] sm:$0xff]  ;;  %v1133_v23 = vld [vmem:[#allocation8 + $0x38] sm:$0xff] }
 0x229   :  { %v742_v21 = vadd.f32 %v741_v34, %v740_v45  ;;  %v2640_v45 = vpack.c.bf16 %v925_v36, %v923_v50  ;;  %v929_v34 = vld [vmem:[#allocation5 + $0x1b8] sm:$0xff]  ;;  %v867_v50 = vsel %vm362_vm1, %v3333_v6, %v866_v42  ;;  %v936_v20 = vld [vmem:[#allocation5 + $0x1f0] sm:$0xff]  ;;  %v2678_v40 = vpack.c.bf16 %v1048_v46, %v1047_v51 }
 0x22a   :  { %v2644_v43 = vpack.c.bf16 %v929_v34, %v927_v55  ;;  %v868_v48 = vsel %vm365_vm2, %v3335_v7, %v867_v50  ;;  %v2136_v7 = vld [vmem:[%s3928_s6] ss:$0 sm:$0xff]  ;;  %v1132_v27 = vld [vmem:[#allocation8 + $0x30] sm:$0xff] }
 0x22b   :  { %v780_v57 = vsel %vm3946_vm5, %v742_v21, %v779_v53  ;;  %2641 = vmatprep.subr.bf16.mxu0 %v2640_v45  ;;  %v1043_v21 = vld [vmem:[#allocation7 + $0x50] sm:$0xff]  ;;  %v926_v53 = vld [vmem:[#allocation5 + $0x1a0] sm:$0xff]  ;;  %v869_v2 = vsel %vm368_vm3, %v3337_v8, %v868_v48  ;;  %vm3947_vm5 = vmmov %vm3944_vm9  ;;  %v2690_v9 = vpack.c.bf16 %v1133_v23, %v1132_v27 }
 0x22c   :  { %2359 = vmatmul.mubr.f32.vlgmr.msra.gmra.mrb[0].mxu1 %v780_v57  ;;  %2643 = vmatpush1.bf16.msra.mxu0 %v2642_v49  ;;  %v2646_v57 = vpack.c.bf16 %v928_v59, %v926_v53  ;;  %v934_v45 = vld [vmem:[#allocation5 + $0x1e0] sm:$0xff]  ;;  %v870_v3 = vsel %vm3947_vm5, %v3344_v13, %v869_v2  ;;  %vm3948_vm9 = vmmov %vm3945_vm6  ;;  %vm3949_vm6 = vcmask 1047559   ;;  %v1128_v59 = vld [vmem:[#allocation8 + $0x10] sm:$0xff] }
 0x22d   :  { %2658 = vmatpush3.bf16.msra.mxu1 %v2657_v35  ;;  %2393 = vmatprep.mubr.msk.f32.mxu1 %vm3942_vm4, %v3090_v12  ;;  %v1044_v35 = vld [vmem:[#allocation7 + $0x58] sm:$0xff]  ;;  %v871_v6 = vsel %vm3948_vm9, %v3346_v14, %v870_v3  ;;  %v1126_v14 = vld [vmem:[#allocation8] sm:$0xff] }
 0x22e   :  { %2659 = vmatprep.subr.bf16.mxu1 %v3088_v39  ;;  %v2672_v62 = vpack.c.bf16 %v1044_v35, %v1043_v21  ;;  %2645 = vmatprep.subr.bf16.mxu0 %v2644_v43  ;;  %v3672_v49 = vsel %vm3949_vm6, %v3348_v15, %v871_v6  ;;  %v1127_v43 = vld [vmem:[#allocation8 + $0x8] sm:$0xff]  ;;  %v1138_v50 = vld [vmem:[#allocation8 + $0x60] sm:$0xff] }
 0x22f   :  { %1014 = vmatprep.mubr.f32.mxu0 %v3672_v49  ;;  %v2681_v53 = vpack.c.bf16 %v1127_v43, %v1126_v14 }
 0x230   :  { %2647 = vmatpush1.bf16.msra.mxu0 %v2646_v57 }
 0x231   :  { %2661 = vmatpush3.bf16.msra.mxu1 %v2660_v10  ;;  %v931_v10 = vld [vmem:[#allocation5 + $0x1c8] sm:$0xff] }
 0x232   :  { %2662 = vmatprep.subr.bf16.mxu1 %v3088_v39 }
 0x235   :  { %2664 = vmatpush3.bf16.msra.mxu1 %v2663_v17  ;;  %v2648_v17 = vpack.c.bf16 %v933_v4, %v931_v10  ;;  %v1130_v4 = vld [vmem:[#allocation8 + $0x20] sm:$0xff] }
 0x236   :  { %2665 = vmatprep.subr.bf16.mxu1 %v3088_v39 }
 0x237   :  { %2649 = vmatprep.subr.bf16.mxu0 %v2648_v17  ;;  %v2687_v17 = vpack.c.bf16 %v1131_v31, %v1130_v4 }
 0x238   :  { %2651 = vmatpush1.bf16.msra.mxu0 %v2650_v22  ;;  %v1135_v22 = vld [vmem:[#allocation8 + $0x48] sm:$0xff] }
 0x239   :  { %2667 = vmatpush3.bf16.msra.mxu1 %v2666_v29  ;;  %v937_v29 = vld [vmem:[#allocation5 + $0x1f8] sm:$0xff] }
 0x23a   :  { %2668 = vmatprep.subr.bf16.mxu1 %v3088_v39  ;;  %v2652_v36 = vpack.c.bf16 %v937_v29, %v935_v54  ;;  %v1136_v54 = vld [vmem:[#allocation8 + $0x50] sm:$0xff]  ;;  %v1137_v29 = vld [vmem:[#allocation8 + $0x58] sm:$0xff] }
 0x23b   :  { %v2696_v51 = vpack.c.bf16 %v1137_v29, %v1136_v54 }
 0x23c   :  { %2653 = vmatprep.subr.bf16.mxu0 %v2652_v36  ;;  %v1139_v36 = vld [vmem:[#allocation8 + $0x68] sm:$0xff] }
 0x23d   :  { %2670 = vmatpush3.bf16.msra.mxu1 %v2669_v52  ;;  %v2654_v52 = vpack.c.bf16 %v936_v20, %v934_v45  ;;  %v2699_v46 = vpack.c.bf16 %v1139_v36, %v1138_v50  ;;  %v1140_v45 = vld [vmem:[#allocation8 + $0x70] sm:$0xff]  ;;  %v1141_v20 = vld [vmem:[#allocation8 + $0x78] sm:$0xff] }
 0x23e   :  { %2671 = vmatprep.subr.bf16.mxu1 %v3088_v39  ;;  %v2702_v48 = vpack.c.bf16 %v1141_v20, %v1140_v45 }
 0x23f   :  { %2655 = vmatpush1.bf16.msra.mxu0 %v2654_v52  ;;  %v938_v52 = vld [vmem:[%s3930_s8] sm:$0x3] }
 0x240   :  { %2704 = vmatprep.subr.bf16.mxu0 %v3088_v39  ;;  %v943_v2 = vrot.slane %v938_v52, %v3387_v25 }
 0x241   :  { %2673 = vmatpush3.bf16.msra.mxu1 %v2672_v62  ;;  %v1129_v62 = vld [vmem:[#allocation8 + $0x18] sm:$0xff] }
 0x242   :  { %2674 = vmatprep.subr.bf16.mxu1 %v3088_v39  ;;  %v2684_v10 = vpack.c.bf16 %v1129_v62, %v1128_v59  ;;  %v2140_v62 = vld [vmem:[%s3932_s10] ss:$0 sm:$0xff] }
 0x245   :  { %2676 = vmatpush3.bf16.msra.mxu1 %v2675_v30  ;;  %v1134_v30 = vld [vmem:[#allocation8 + $0x40] sm:$0xff] }
 0x246   :  { %2677 = vmatprep.subr.bf16.mxu1 %v3088_v39  ;;  %v2693_v42 = vpack.c.bf16 %v1135_v22, %v1134_v30 }
 0x249   :  { %2679 = vmatpush3.bf16.msra.mxu1 %v2678_v40  ;;  %v2145_v40 = vld [vmem:[%s3926_s4 + $0x1] ss:$0 sm:$0xff] }
 0x24a   :  { %2680 = vmatprep.subr.bf16.mxu1 %v3088_v39  ;;  %1294 = vrot.lane.b32.xlu0 %v2145_v40, %s3091_s28 }
 0x2bc   :  { %v1295_v40 = vpop.permute.xlu0 %1294 }
 0x2ff   :  { %v848_v8 = vpop.f32.mrb[0].mxu1 }
 0x300   :  { %v849_v13 = vadd.f32 %v2136_v7, %v848_v8  ;;  %v2360_v55 = vpop.f32.mrb[1].mxu1 }
 0x302   :  { %v853_v34 = vmin.f32 %v849_v13, 0.0  ;;  %vm852_vm5 = vcmp.gt.f32.partialorder %v849_v13, 0.0 }
 0x304   :  { %v854_v21 = vmul.f32 1.442695, %v853_v34  ;;  %v947_v34 = vrot.slane %v938_v52, %v3384_v19 }
 0x306   :  { %2889 = vpow2.f32 %v854_v21 }
 0x310   :  { %v2890_v15 = vpop.eup %2889 }
 0x311   :  { %v2137_v35 = vadd.f32 -1.0, %v2890_v15 }
 0x313   :  { %v857_v57 = vsel %vm852_vm5, %v849_v13, %v2137_v35 }
 0x314   :  { %1015 = vmatmul.mubr.f32.vlgmr.msra.gmra.mrb[8].mxu0 %v857_v57  ;;  %2394 = vmatmul.mubr.f32.vlgmr.msra.gmra.mrb[2].mxu1 %v857_v57 }
 0x315   :  { %2682 = vmatpush3.bf16.msra.mxu1 %v2681_v53  ;;  %2428 = vmatprep.mubr.msk.f32.mxu1 %vm3942_vm4, %v3090_v12  ;;  %v2141_v53 = vld [vmem:[%s3934_s12] ss:$0 sm:$0xff] }
 0x316   :  { %2683 = vmatprep.subr.bf16.mxu1 %v3088_v39  ;;  %2463 = vmatprep.mubr.msk.f32.mxu0 %vm3942_vm4, %v3090_v12 }
 0x319   :  { %2685 = vmatpush3.bf16.msra.mxu1 %v2684_v10 }
 0x31a   :  { %2686 = vmatprep.subr.bf16.mxu1 %v3088_v39 }
 0x31d   :  { %2688 = vmatpush3.bf16.msra.mxu1 %v2687_v17 }
 0x31e   :  { %2689 = vmatprep.subr.bf16.mxu1 %v3088_v39 }
 0x321   :  { %2691 = vmatpush3.bf16.msra.mxu1 %v2690_v9 }
 0x322   :  { %2692 = vmatprep.subr.bf16.mxu1 %v3088_v39 }
 0x325   :  { %2694 = vmatpush3.bf16.msra.mxu1 %v2693_v42 }
 0x326   :  { %2695 = vmatprep.subr.bf16.mxu1 %v3088_v39 }
 0x329   :  { %2697 = vmatpush3.bf16.msra.mxu1 %v2696_v51  ;;  %v2143_v51 = vld [vmem:[%s3924_s2 + $0x1] ss:$0 sm:$0xff]  ;;  %s3092_s2 = smov 127  }
 0x32a   :  { %2698 = vmatprep.subr.bf16.mxu1 %v3088_v39 }
 0x32d   :  { %2700 = vmatpush3.bf16.msra.mxu1 %v2699_v46 }
 0x32e   :  { %2701 = vmatprep.subr.bf16.mxu1 %v3088_v39 }
 0x331   :  { %2703 = vmatpush3.bf16.msra.mxu1 %v2702_v48 }
 0x334   :  { %2429 = vmatmul.mubr.f32.vlgmr.msra.gmra.mrb[4].mxu1 %v3672_v49 }
 0x3e7   :  { %v1016_v3 = vpop.f32.mrb[8].mxu0  ;;  %v1122_v6 = vpop.f32.mrb[2].mxu1 }
 0x3e8   :  { %v1017_v7 = vadd.f32 %v1016_v3, %v943_v2  ;;  %v1018_v8 = vpop.f32.mrb[9].mxu0  ;;  %v2395_v13 = vpop.f32.mrb[3].mxu1  ;;  %v1123_v17 = vadd.f32 %v2140_v62, %v1122_v6 }
 0x3e9   :  { %v1019_v21 = vadd.f32 %v1018_v8, %v947_v34 }
 0x3ea   :  { %v2138_v55 = vmul.f32 -1.442695, %v1017_v7 }
 0x3eb   :  { %v2139_v14 = vmul.f32 -1.442695, %v1019_v21 }
 0x3ec   :  { %2891 = vpow2.f32 %v2138_v55 }
 0x3ed   :  { %2893 = vpow2.f32 %v2139_v14 }
 0x3f6   :  { %v2892_v43 = vpop.eup %2891 }
 0x3f7   :  { %v1024_v15 = vadd.f32 1.0, %v2892_v43  ;;  %v2894_v35 = vpop.eup %2893 }
 0x3f8   :  { %v1030_v59 = vadd.f32 1.0, %v2894_v35 }
 0x3f9   :  { %2895 = vrcp.f32 %v1024_v15 }
 0x3fa   :  { %2897 = vrcp.f32 %v1030_v59 }
 0x403   :  { %v2896_v31 = vpop.eup %2895 }
 0x404   :  { %v2898_v9 = vpop.eup %2897 }
 0x405   :  { %v1222_v30 = vsub.f32 1.0, %v2898_v9  ;;  %v1224_v54 = vmul.f32 %v2898_v9, %v3672_v49 }
 0x407   :  { %v1215_v57 = vpop.f32.mrb[4].mxu1 }
 0x408   :  { %v1216_v10 = vadd.f32 %v2141_v53, %v1215_v57  ;;  %v2430_v4 = vpop.f32.mrb[5].mxu1 }
 0x40a   :  { %v1219_v27 = vmul.f32 %v2896_v31, %v1216_v10 }
 0x40c   :  { %v1220_v23 = vadd.f32 %v1219_v27, %v1123_v17 }
 0x40e   :  { %2899 = vtanh.f32 %v1220_v23 }
 0x418   :  { %v2900_v22 = vpop.eup %2899 }
 0x419   :  { %v1223_v42 = vmul.f32 %v2900_v22, %v1222_v30 }
 0x41b   :  { %v3707_v29 = vadd.f32 %v1224_v54, %v1223_v42 }
 0x41d   :  { %1892 = vmatprep.mubr.f32.mxu1 %v3707_v29  ;;  %v1226_v50 = vmax.f32 %v3707_v29, 0.0 }
 0x41f   :  { %v1235_v36 = vmul.f32 %v2143_v51, %v1226_v50 }
 0x421   :  { %1236 = vadd.xlane.f32.xlu1 %v1235_v36 }
 0x4ae   :  { %v1237_v46 = vpop.xlane.xlu1 %1236 }
 0x4af   :  { %v1258_v45 = vrot.slane %v1237_v46, %v401_v0  ;;  %v1242_v20 = vrot.slane %v1237_v46, %v3387_v25  ;;  %v1246_v49 = vrot.slane %v1237_v46, %v3384_v19  ;;  %v1250_v48 = vrot.slane %v1237_v46, %v393_v58 }
 0x4b0   :  { %v1254_v6 = vrot.slane %v1237_v46, %v397_v32  ;;  %v3950_v32 = vsub.s32 6, %v3381_v56 }
 0x4b1   :  { %v1283_v52 = vadd.f32 %v1258_v45, %v3479_v47  ;;  %v1279_v2 = vadd.f32 %v1242_v20, %v3401_v60  ;;  %v1280_v3 = vadd.f32 %v3392_v37, %v1246_v49  ;;  %v1281_v13 = vadd.f32 %v1250_v48, %v3439_v28 }
 0x4b2   :  { %v1282_v58 = vadd.f32 %v3427_v16, %v1254_v6  ;;  %v1262_v47 = vrot.slane %v1237_v46, %v405_v63  ;;  %v1266_v28 = vrot.slane %v1237_v46, %v3950_v32  ;;  %v3951_v63 = vsub.s32 7, %v3381_v56 }
 0x4b3   :  { %v1301_v7 = vadd.f32 %v1295_v40, %v1283_v52  ;;  %v1297_v8 = vadd.f32 %v1295_v40, %v1279_v2  ;;  %v1298_v0 = vadd.f32 %v1295_v40, %v1280_v3  ;;  %v1299_v14 = vadd.f32 %v1295_v40, %v1281_v13 }
 0x4b4   :  { %v1300_v35 = vadd.f32 %v1295_v40, %v1282_v58  ;;  %v1284_v16 = vadd.f32 %v3464_v41, %v1262_v47  ;;  %v1270_v53 = vrot.slane %v1237_v46, %v3951_v63  ;;  %v1285_v10 = vadd.f32 %v1266_v28, %v3509_v5 }
 0x4b5   :  { %vm1309_vm9 = vcmp.ge.f32.partialorder %v1301_v7, 0.0  ;;  %v1317_v55 = vmul.f32 0.01, %v1301_v7  ;;  %vm1305_vm6 = vcmp.ge.f32.partialorder %v1297_v8, 0.0  ;;  %v1313_v34 = vmul.f32 0.01, %v1297_v8 }
 0x4b6   :  { %v1314_v37 = vmul.f32 0.01, %v1298_v0  ;;  %vm1306_vm5 = vcmp.ge.f32.partialorder %v1298_v0, 0.0  ;;  %v1315_v15 = vmul.f32 0.01, %v1299_v14  ;;  %v1302_v57 = vadd.f32 %v1295_v40, %v1284_v16 }
 0x4b7   :  { %v1325_v60 = vsel %vm1309_vm9, %v1301_v7, %v1317_v55  ;;  %v1321_v21 = vsel %vm1305_vm6, %v1297_v8, %v1313_v34  ;;  %vm1307_vm9 = vcmp.ge.f32.partialorder %v1299_v14, 0.0  ;;  %v1316_v62 = vmul.f32 0.01, %v1300_v35 }
 0x4b8   :  { %1345 = vrot.lane.b32.xlu1 %v1325_v60, %s3092_s2  ;;  %1337 = vrot.lane.b32.xlu0 %v1321_v21, %s3092_s2  ;;  %v1322_v43 = vsel %vm1306_vm5, %v1298_v0, %v1314_v37  ;;  %v1323_v59 = vsel %vm1307_vm9, %v1299_v14, %v1315_v15  ;;  %vm1308_vm6 = vcmp.ge.f32.partialorder %v1300_v35, 0.0  ;;  %v1318_v31 = vmul.f32 0.01, %v1302_v57 }
 0x4b9   :  { %v1324_v4 = vsel %vm1308_vm6, %v1300_v35, %v1316_v62  ;;  %v1303_v17 = vadd.f32 %v1295_v40, %v1285_v10  ;;  %v1286_v27 = vadd.f32 %v3497_v26, %v1270_v53  ;;  %vm1310_vm5 = vcmp.ge.f32.partialorder %v1302_v57, 0.0 }
 0x4ba   :  { %v1326_v41 = vsel %vm1310_vm5, %v1302_v57, %v1318_v31 }
 0x4bb   :  { %v1319_v23 = vmul.f32 0.01, %v1303_v17  ;;  %v1304_v9 = vadd.f32 %v1295_v40, %v1286_v27  ;;  %vm1311_vm9 = vcmp.ge.f32.partialorder %v1303_v17, 0.0 }
 0x4bc   :  { %1339 = vrot.lane.b32.xlu0 %v1322_v43, %s3092_s2 }
 0x4bd   :  { %v1327_v30 = vsel %vm1311_vm9, %v1303_v17, %v1319_v23  ;;  %v1320_v22 = vmul.f32 0.01, %v1304_v9  ;;  %vm1312_vm4 = vcmp.ge.f32.partialorder %v1304_v9, 0.0 }
 0x4bf   :  { %v1328_v5 = vsel %vm1312_vm4, %v1304_v9, %v1320_v22  ;;  %vm3952_vm4 = vcmp.lt.s32.totalorder %v3381_v56, %v3506_v24 }
 0x4c0   :  { %1341 = vrot.lane.b32.xlu0 %v1323_v59, %s3092_s2 }
 0x4c4   :  { %1343 = vrot.lane.b32.xlu0 %v1324_v4, %s3092_s2 }
 0x4c8   :  { %1347 = vrot.lane.b32.xlu0 %v1326_v41, %s3092_s2 }
 0x4cc   :  { %1349 = vrot.lane.b32.xlu0 %v1327_v30, %s3092_s2 }
 0x4d0   :  { %1351 = vrot.lane.b32.xlu0 %v1328_v5, %s3092_s2 }
 0x52a   :  { %v1346_v42 = vpop.permute.xlu1 %1345  ;;  %v1338_v54 = vpop.permute.xlu0 %1337 }
 0x52b   :  { %v1365_v26 = vsel %vm154_vm11, %v1346_v42, -1e+30  ;;  %v1361_v51 = vsel %vm150_vm10, %v1338_v54, -1e+30 }
 0x52c   :  { %v1397_v50 = vsel %vm478_vm8, %v1365_v26, -inf  ;;  %v1369_v36 = vsel %vm478_vm8, %v1361_v51, -inf }
 0x52d   :  { %v1398_v46 = vrot.slane %v1397_v50, 4  ;;  %v1370_v45 = vrot.slane %v1369_v36, 4 }
 0x52e   :  { %v1340_v20 = vpop.permute.xlu0 %1339 }
 0x52f   :  { %v1399_v49 = vmax.f32 %v1397_v50, %v1398_v46  ;;  %v1371_v48 = vmax.f32 %v1369_v36, %v1370_v45  ;;  %v1362_v40 = vsel %vm151_vm7, %v1340_v20, -1e+30 }
 0x530   :  { %v1376_v52 = vsel %vm478_vm8, %v1362_v40, -inf }
 0x531   :  { %v1400_v2 = vrot.slane %v1399_v49, 2  ;;  %v1372_v3 = vrot.slane %v1371_v48, 2  ;;  %v1377_v6 = vrot.slane %v1376_v52, 4 }
 0x532   :  { %v1342_v7 = vpop.permute.xlu0 %1341 }
 0x533   :  { %v1401_v8 = vmax.f32 %v1399_v49, %v1400_v2  ;;  %v1373_v0 = vmax.f32 %v1371_v48, %v1372_v3  ;;  %v1378_v13 = vmax.f32 %v1376_v52, %v1377_v6  ;;  %v1363_v55 = vsel %vm152_vm13, %v1342_v7, -1e+30 }
 0x534   :  { %v1383_v34 = vsel %vm478_vm8, %v1363_v55, -inf }
 0x535   :  { %v1402_v58 = vrot.slane %v1401_v8, 1  ;;  %v1374_v47 = vrot.slane %v1373_v0, 1  ;;  %v1379_v60 = vrot.slane %v1378_v13, 2  ;;  %v1384_v21 = vrot.slane %v1383_v34, 4 }
 0x536   :  { %v1344_v37 = vpop.permute.xlu0 %1343 }
 0x537   :  { %v1403_v14 = vmax.f32 %v1401_v8, %v1402_v58  ;;  %v1375_v32 = vmax.f32 %v1373_v0, %v1374_v47  ;;  %v1380_v28 = vmax.f32 %v1378_v13, %v1379_v60  ;;  %v1385_v43 = vmax.f32 %v1383_v34, %v1384_v21 }
 0x538   :  { %v1364_v15 = vsel %vm153_vm12, %v1344_v37, -1e+30 }
 0x539   :  { %v1429_v35 = vsub.f32 %v1365_v26, %v1403_v14  ;;  %v1425_v16 = vsub.f32 %v1361_v51, %v1375_v32  ;;  %v1381_v63 = vrot.slane %v1380_v28, 1  ;;  %v1386_v53 = vrot.slane %v1385_v43, 2 }
 0x53a   :  { %v1390_v59 = vsel %vm478_vm8, %v1364_v15, -inf  ;;  %v1348_v62 = vpop.permute.xlu0 %1347 }
 0x53b   :  { %v1441_v57 = vmul.f32 1.442695, %v1429_v35  ;;  %v1433_v10 = vmul.f32 1.442695, %v1425_v16  ;;  %v1382_v4 = vmax.f32 %v1380_v28, %v1381_v63  ;;  %v1387_v31 = vmax.f32 %v1385_v43, %v1386_v53 }
 0x53c   :  { %v1391_v17 = vrot.slane %v1390_v59, 4  ;;  %v1366_v27 = vsel %vm155_vm15, %v1348_v62, -1e+30 }
 0x53d   :  { %2901 = vpow2.f32 %v1441_v57  ;;  %v1426_v41 = vsub.f32 %v1362_v40, %v1382_v4  ;;  %v1388_v23 = vrot.slane %v1387_v31, 1  ;;  %v1404_v9 = vsel %vm478_vm8, %v1366_v27, -inf }
 0x53e   :  { %2903 = vpow2.f32 %v1433_v10  ;;  %v1392_v30 = vmax.f32 %v1390_v59, %v1391_v17  ;;  %v1405_v22 = vrot.slane %v1404_v9, 4  ;;  %v1350_v5 = vpop.permute.xlu0 %1349 }
 0x53f   :  { %v1435_v42 = vmul.f32 1.442695, %v1426_v41  ;;  %v1389_v54 = vmax.f32 %v1387_v31, %v1388_v23  ;;  %v1367_v26 = vsel %vm156_vm14, %v1350_v5, -1e+30 }
 0x540   :  { %v1393_v51 = vrot.slane %v1392_v30, 2  ;;  %v1406_v50 = vmax.f32 %v1404_v9, %v1405_v22  ;;  %v1411_v36 = vsel %vm478_vm8, %v1367_v26, -inf }
 0x541   :  { %2905 = vpow2.f32 %v1435_v42  ;;  %v1427_v46 = vsub.f32 %v1363_v55, %v1389_v54  ;;  %v1412_v45 = vrot.slane %v1411_v36, 4 }
 0x542   :  { %v1394_v20 = vmax.f32 %v1392_v30, %v1393_v51  ;;  %v1407_v49 = vrot.slane %v1406_v50, 2  ;;  %v1352_v48 = vpop.permute.xlu0 %1351 }
 0x543   :  { %v1437_v40 = vmul.f32 1.442695, %v1427_v46  ;;  %v1413_v52 = vmax.f32 %v1411_v36, %v1412_v45  ;;  %v1368_v2 = vsel %vm3952_vm4, %v1352_v48, -1e+30 }
 0x544   :  { %v1395_v3 = vrot.slane %v1394_v20, 1  ;;  %v1408_v6 = vmax.f32 %v1406_v50, %v1407_v49  ;;  %v1418_v7 = vsel %vm478_vm8, %v1368_v2, -inf }
 0x545   :  { %2907 = vpow2.f32 %v1437_v40  ;;  %v1414_v8 = vrot.slane %v1413_v52, 2  ;;  %v1419_v0 = vrot.slane %v1418_v7, 4 }
 0x546   :  { %v1396_v13 = vmax.f32 %v1394_v20, %v1395_v3  ;;  %v1409_v34 = vrot.slane %v1408_v6, 1 }
 0x547   :  { %v2902_v55 = vpop.eup %2901  ;;  %v1415_v58 = vmax.f32 %v1413_v52, %v1414_v8  ;;  %v1420_v47 = vmax.f32 %v1418_v7, %v1419_v0 }
 0x548   :  { %v2904_v60 = vpop.eup %2903  ;;  %v1428_v21 = vsub.f32 %v1364_v15, %v1396_v13  ;;  %v1410_v37 = vmax.f32 %v1408_v6, %v1409_v34  ;;  %v3779_v14 = vsel %vm154_vm11, %v2902_v55, 0.0 }
 0x549   :  { %v1416_v32 = vrot.slane %v1415_v58, 1  ;;  %v1421_v28 = vrot.slane %v1420_v47, 2  ;;  %v3784_v43 = vsel %vm150_vm10, %v2904_v60, 0.0  ;;  %v1485_v35 = vsel %vm478_vm8, %v3779_v14, 0.0 }
 0x54a   :  { %v1439_v16 = vmul.f32 1.442695, %v1428_v21  ;;  %v1430_v63 = vsub.f32 %v1366_v27, %v1410_v37  ;;  %v1457_v15 = vsel %vm478_vm8, %v3784_v43, 0.0  ;;  %v1486_v53 = vrot.slane %v1485_v35, 4 }
 0x54b   :  { %v2906_v59 = vpop.eup %2905  ;;  %v1417_v38 = vmax.f32 %v1415_v58, %v1416_v32  ;;  %v1422_v62 = vmax.f32 %v1420_v47, %v1421_v28  ;;  %v1458_v57 = vrot.slane %v1457_v15, 4 }
 0x54c   :  { %2909 = vpow2.f32 %v1439_v16  ;;  %v1443_v10 = vmul.f32 1.442695, %v1430_v63  ;;  %v3793_v1 = vsel %vm151_vm7, %v2906_v59, 0.0  ;;  %v1487_v4 = vadd.f32 %v1486_v53, %v1485_v35  ;;  %vm3953_vm7 = vmmov %vm3952_vm4 }
 0x54d   :  { %v1431_v31 = vsub.f32 %v1367_v26, %v1417_v38  ;;  %v1423_v17 = vrot.slane %v1422_v62, 1  ;;  %v1459_v41 = vadd.f32 %v1458_v57, %v1457_v15  ;;  %v1464_v27 = vsel %vm478_vm8, %v3793_v1, 0.0 }
 0x54e   :  { %2911 = vpow2.f32 %v1443_v10  ;;  %v1465_v23 = vrot.slane %v1464_v27, 4  ;;  %v1488_v9 = vrot.slane %v1487_v4, 2 }
 0x54f   :  { %v2908_v30 = vpop.eup %2907  ;;  %v1445_v22 = vmul.f32 1.442695, %v1431_v31  ;;  %v1424_v5 = vmax.f32 %v1422_v62, %v1423_v17  ;;  %v1460_v42 = vrot.slane %v1459_v41, 2 }
 0x550   :  { %v1466_v54 = vadd.f32 %v1465_v23, %v1464_v27  ;;  %v3800_v61 = vsel %vm152_vm13, %v2908_v30, 0.0  ;;  %v1489_v45 = vadd.f32 %v1488_v9, %v1487_v4 }
 0x551   :  { %2913 = vpow2.f32 %v1445_v22  ;;  %v1432_v26 = vsub.f32 %v1368_v2, %v1424_v5  ;;  %v1461_v51 = vadd.f32 %v1460_v42, %v1459_v41  ;;  %v1471_v50 = vsel %vm478_vm8, %v3800_v61, 0.0 }
 0x552   :  { %v1467_v36 = vrot.slane %v1466_v54, 2  ;;  %v1472_v46 = vrot.slane %v1471_v50, 4  ;;  %v1490_v7 = vrot.slane %v1489_v45, 1 }
 0x553   :  { %v1447_v20 = vmul.f32 1.442695, %v1432_v26  ;;  %v1462_v49 = vrot.slane %v1461_v51, 1 }
 0x554   :  { %v1468_v48 = vadd.f32 %v1467_v36, %v1466_v54  ;;  %v1473_v40 = vadd.f32 %v1472_v46, %v1471_v50  ;;  %v1491_v37 = vadd.f32 %v1490_v7, %v1489_v45 }
 0x555   :  { %2915 = vpow2.f32 %v1447_v20  ;;  %v1463_v52 = vadd.f32 %v1462_v49, %v1461_v51 }
 0x556   :  { %v2910_v3 = vpop.eup %2909  ;;  %v1469_v6 = vrot.slane %v1468_v48, 1  ;;  %v1474_v18 = vrot.slane %v1473_v40, 2  ;;  %v1517_v38 = vmax.f32 %v1491_v37, 1e-20 }
 0x557   :  { %v1513_v8 = vmax.f32 %v1463_v52, 1e-20  ;;  %v3807_v2 = vsel %vm153_vm12, %v2910_v3, 0.0 }
 0x558   :  { %v2912_v0 = vpop.eup %2911  ;;  %v1470_v13 = vadd.f32 %v1469_v6, %v1468_v48  ;;  %v1475_v34 = vadd.f32 %v1474_v18, %v1473_v40  ;;  %v1478_v55 = vsel %vm478_vm8, %v3807_v2, 0.0 }
 0x559   :  { %2917 = vrcp.f32 %v1513_v8  ;;  %v1479_v58 = vrot.slane %v1478_v55, 4  ;;  %v3814_v47 = vsel %vm155_vm15, %v2912_v0, 0.0  ;;  %v1634_v8 = vld [vmem:[#allocation2 + $0x80] sm:$0xff] }
 0x55a   :  { %v1514_v60 = vmax.f32 %v1470_v13, 1e-20  ;;  %v1476_v21 = vrot.slane %v1475_v34, 1  ;;  %v1492_v11 = vsel %vm478_vm8, %v3814_v47, 0.0 }
 0x55b   :  { %v2914_v32 = vpop.eup %2913  ;;  %v1480_v28 = vadd.f32 %v1479_v58, %v1478_v55  ;;  %v1493_v35 = vrot.slane %v1492_v11, 4  ;;  %v1637_v58 = vld [vmem:[#allocation2 + $0x98] sm:$0xff] }
 0x55c   :  { %2919 = vrcp.f32 %v1514_v60  ;;  %v1477_v16 = vadd.f32 %v1476_v21, %v1475_v34  ;;  %v3821_v63 = vsel %vm156_vm14, %v2914_v32, 0.0  ;;  %v1639_v32 = vld [vmem:[#allocation2 + $0xa8] sm:$0xff] }
 0x55d   :  { %v1481_v15 = vrot.slane %v1480_v28, 2  ;;  %v1494_v33 = vadd.f32 %v1493_v35, %v1492_v11  ;;  %v1499_v53 = vsel %vm478_vm8, %v3821_v63, 0.0  ;;  %v1638_v11 = vld [vmem:[#allocation2 + $0xa0] sm:$0xff] }
 0x55e   :  { %v1515_v59 = vmax.f32 %v1477_v16, 1e-20  ;;  %v1500_v62 = vrot.slane %v1499_v53, 4  ;;  %v1640_v16 = vld [vmem:[#allocation2 + $0xb0] sm:$0xff] }
 0x55f   :  { %v2916_v57 = vpop.eup %2915  ;;  %v1482_v10 = vadd.f32 %v1481_v15, %v1480_v28  ;;  %v1495_v4 = vrot.slane %v1494_v33, 2  ;;  %v1641_v15 = vld [vmem:[#allocation2 + $0xb8] sm:$0xff] }
 0x560   :  { %2921 = vrcp.f32 %v1515_v59  ;;  %v1501_v31 = vadd.f32 %v1500_v62, %v1499_v53  ;;  %v1456_v17 = vsel %vm3953_vm7, %v2916_v57, 0.0  ;;  %v1644_v59 = vld [vmem:[#allocation2 + $0xd0] sm:$0xff]  ;;  %v1646_v57 = vld [vmem:[#allocation2 + $0xe0] sm:$0xff] }
 0x561   :  { %v1483_v44 = vrot.slane %v1482_v10, 1  ;;  %v1496_v41 = vadd.f32 %v1495_v4, %v1494_v33  ;;  %v1506_v27 = vsel %vm478_vm8, %v1456_v17, 0.0  ;;  %2923 = vrcp.f32 %v1517_v38  ;;  %v1643_v33 = vld [vmem:[#allocation2 + $0xc8] sm:$0xff]  ;;  %v1645_v38 = vld [vmem:[#allocation2 + $0xd8] sm:$0xff] }
 0x562   :  { %v1502_v23 = vrot.slane %v1501_v31, 2  ;;  %v1507_v9 = vrot.slane %v1506_v27, 4  ;;  %v2720_v62 = vpack.c.bf16 %v1645_v38, %v1644_v59  ;;  %v1783_v38 = vld [vmem:[#allocation5 + $0x300] sm:$0xff]  ;;  %vm3954_vm8 = vcmask 1045509  }
 0x563   :  { %v2918_v30 = vpop.eup %2917  ;;  %v1484_v22 = vadd.f32 %v1483_v44, %v1482_v10  ;;  %v1497_v5 = vrot.slane %v1496_v41, 1  ;;  %v1647_v10 = vld [vmem:[#allocation2 + $0xe8] sm:$0xff] }
 0x564   :  { %v1529_v42 = vmul.f32 %v2918_v30, %v3784_v43  ;;  %v1503_v54 = vadd.f32 %v1502_v23, %v1501_v31  ;;  %v1508_v26 = vadd.f32 %v1507_v9, %v1506_v27  ;;  %v2723_v4 = vpack.c.bf16 %v1647_v10, %v1646_v57  ;;  %v1648_v31 = vld [vmem:[#allocation2 + $0xf0] sm:$0xff]  ;;  %v1754_v27 = vld [vmem:[#allocation5 + $0x218] sm:$0xff]  ;;  %v1751_v23 = vld [vmem:[#allocation5 + $0x200] sm:$0xff] }
 0x565   :  { %v1516_v51 = vmax.f32 %v1484_v22, 1e-20  ;;  %v1498_v50 = vadd.f32 %v1497_v5, %v1496_v41  ;;  %v1752_v41 = vld [vmem:[#allocation5 + $0x208] sm:$0xff]  ;;  %v1753_v30 = vld [vmem:[#allocation5 + $0x210] sm:$0xff]  ;;  %v1758_v5 = vld [vmem:[#allocation5 + $0x238] sm:$0xff] }
 0x566   :  { %v2920_v36 = vpop.eup %2919  ;;  %1539 = vperm.xlu0 %2855, %v1529_v42   ;;  %v1504_v56 = vrot.slane %v1503_v54, 1  ;;  %v1509_v24 = vrot.slane %v1508_v26, 2  ;;  %v2728_v9 = vpack.c.bf16 %v1754_v27, %v1752_v41  ;;  %v1756_v22 = vld [vmem:[#allocation5 + $0x228] sm:$0xff]  ;;  %v2730_v42 = vpack.c.bf16 %v1753_v30, %v1751_v23  ;;  %v1790_v10 = vld [vmem:[#allocation5 + $0x338] sm:$0xff]  ;;  %v1791_v30 = vld [vmem:[#allocation5 + $0x340] sm:$0xff] }
 0x567   :  { %v1530_v46 = vmul.f32 %v2920_v36, %v3793_v1  ;;  %2925 = vrcp.f32 %v1516_v51  ;;  %v1518_v45 = vmax.f32 %v1498_v50, 1e-20  ;;  %v1635_v1 = vld [vmem:[#allocation2 + $0x88] sm:$0xff]  ;;  %v1757_v51 = vld [vmem:[#allocation5 + $0x230] sm:$0xff]  ;;  %v1762_v36 = vld [vmem:[#allocation5 + $0x258] sm:$0xff] }
 0x568   :  { %v1505_v20 = vadd.f32 %v1504_v56, %v1503_v54  ;;  %v1510_v49 = vadd.f32 %v1509_v24, %v1508_v26  ;;  %v2705_v0 = vpack.c.bf16 %v1635_v1, %v1634_v8  ;;  %v2732_v54 = vpack.c.bf16 %v1758_v5, %v1756_v22  ;;  %v1755_v26 = vld [vmem:[#allocation5 + $0x220] sm:$0xff]  ;;  %v1760_v50 = vld [vmem:[#allocation5 + $0x248] sm:$0xff]  ;;  %2729 = vmatprep.subr.bf16.mxu1 %v2728_v9  ;;  %v1769_v1 = vld [vmem:[#allocation5 + $0x290] sm:$0xff] }
 0x569   :  { %1544 = vperm.xlu1 %2856, %v1530_v46   ;;  %2927 = vrcp.f32 %v1518_v45  ;;  %2731 = vmatpush1.bf16.msra.mxu1 %v2730_v42  ;;  %v2734_v56 = vpack.c.bf16 %v1757_v51, %v1755_v26  ;;  %v2736_v24 = vpack.c.bf16 %v1762_v36, %v1760_v50  ;;  %v1759_v46 = vld [vmem:[#allocation5 + $0x240] sm:$0xff]  ;;  %v1761_v45 = vld [vmem:[#allocation5 + $0x250] sm:$0xff]  ;;  %v1788_v57 = vld [vmem:[#allocation5 + $0x328] sm:$0xff] }
 0x56a   :  { %v2922_v48 = vpop.eup %2921  ;;  %v1519_v40 = vmax.f32 %v1505_v20, 1e-20  ;;  %v1511_v52 = vrot.slane %v1510_v49, 1  ;;  %2706 = vmatpush3.bf16.msra.mxu0 %v2705_v0  ;;  %2733 = vmatprep.subr.bf16.mxu1 %v2732_v54  ;;  %v1764_v20 = vld [vmem:[#allocation5 + $0x268] sm:$0xff]  ;;  %v1767_v8 = vld [vmem:[#allocation5 + $0x280] sm:$0xff]  ;;  %v1794_v27 = vld [vmem:[#allocation5 + $0x358] sm:$0xff] }
 0x56b   :  { %v1531_v43 = vmul.f32 %v2922_v48, %v3800_v61  ;;  %v2924_v3 = vpop.eup %2923  ;;  %2707 = vmatprep.subr.bf16.mxu0 %v3088_v39  ;;  %v1636_v61 = vld [vmem:[#allocation2 + $0x90] sm:$0xff]  ;;  %v2738_v48 = vpack.c.bf16 %v1761_v45, %v1759_v46  ;;  %v1772_v0 = vld [vmem:[#allocation5 + $0x2a8] sm:$0xff]  ;;  %v2953_v26 = vld [vmem:[%s3922_s0] sm:$0xff] }
 0x56c   :  { %2929 = vrcp.f32 %v1519_v40  ;;  %v1512_v6 = vadd.f32 %v1511_v52, %v1510_v49  ;;  %v1533_v7 = vmul.f32 %v2924_v3, %v3779_v14  ;;  %v2708_v21 = vpack.c.bf16 %v1637_v58, %v1636_v61  ;;  %v1766_v49 = vld [vmem:[#allocation5 + $0x278] sm:$0xff]  ;;  %v1763_v52 = vld [vmem:[#allocation5 + $0x260] sm:$0xff]  ;;  %v1768_v3 = vld [vmem:[#allocation5 + $0x288] sm:$0xff] }
 0x56d   :  { %1549 = vperm.xlu0 %2855, %v1531_v43   ;;  %2735 = vmatpush1.bf16.msra.mxu1 %v2734_v56  ;;  %v2740_v40 = vpack.c.bf16 %v1766_v49, %v1764_v20  ;;  %v1765_v43 = vld [vmem:[#allocation5 + $0x270] sm:$0xff]  ;;  %v1771_v61 = vld [vmem:[#allocation5 + $0x2a0] sm:$0xff]  ;;  %v1792_v41 = vld [vmem:[#allocation5 + $0x348] sm:$0xff] }
 0x56e   :  { %v1520_v18 = vmax.f32 %v1512_v6, 1e-20  ;;  %2709 = vmatpush3.bf16.msra.mxu0 %v2708_v21  ;;  %2737 = vmatprep.subr.bf16.mxu1 %v2736_v24  ;;  %v1770_v6 = vld [vmem:[#allocation5 + $0x298] sm:$0xff]  ;;  %v1773_v58 = vld [vmem:[#allocation5 + $0x2b0] sm:$0xff]  ;;  %v2768_v9 = vpack.c.bf16 %v1794_v27, %v1792_v41  ;;  %v2954_v50 = vld [vmem:[%s3922_s0 + $0x8] sm:$0xff] }
 0x56f   :  { %2710 = vmatprep.subr.bf16.mxu0 %v3088_v39  ;;  %v1778_v21 = vld [vmem:[#allocation5 + $0x2d8] sm:$0xff]  ;;  %v1793_v22 = vld [vmem:[#allocation5 + $0x350] sm:$0xff] }
 0x570   :  { %2931 = vrcp.f32 %v1520_v18  ;;  %v2742_v18 = vpack.c.bf16 %v1765_v43, %v1763_v52  ;;  %v2770_v5 = vpack.c.bf16 %v1793_v22, %v1791_v30  ;;  %v2955_v45 = vld [vmem:[%s3922_s0 + $0x10] sm:$0xff] }
 0x571   :  { %v2926_v13 = vpop.eup %2925  ;;  %1559 = vperm.xlu0 %2855, %v1533_v7   ;;  %2739 = vmatpush1.bf16.msra.mxu1 %v2738_v48  ;;  %v2744_v7 = vpack.c.bf16 %v1770_v6, %v1768_v3  ;;  %v2956_v3 = vld [vmem:[%s3922_s0 + $0x20] sm:$0xff] }
 0x572   :  { %v1532_v34 = vmul.f32 %v2926_v13, %v3807_v2  ;;  %v2711_v2 = vpack.c.bf16 %v1639_v32, %v1638_v11  ;;  %2741 = vmatprep.subr.bf16.mxu1 %v2740_v40  ;;  %v1774_v13 = vld [vmem:[#allocation5 + $0x2b8] sm:$0xff]  ;;  %v1775_v11 = vld [vmem:[#allocation5 + $0x2c0] sm:$0xff]  ;;  %v1777_v32 = vld [vmem:[#allocation5 + $0x2d0] sm:$0xff] }
 0x573   :  { %v2928_v55 = vpop.eup %2927 }
 0x574   :  { %1554 = vperm.xlu1 %2856, %v1532_v34   ;;  %v1534_v60 = vmul.f32 %v2928_v55, %v3814_v47  ;;  %2712 = vmatpush3.bf16.msra.mxu0 %v2711_v2  ;;  %v2714_v47 = vpack.c.bf16 %v1641_v15, %v1640_v16  ;;  %v2746_v34 = vpack.c.bf16 %v1769_v1, %v1767_v8  ;;  %v1780_v2 = vld [vmem:[#allocation5 + $0x2e8] sm:$0xff]  ;;  %v1779_v15 = vld [vmem:[#allocation5 + $0x2e0] sm:$0xff] }
 0x575   :  { %2713 = vmatprep.subr.bf16.mxu0 %v3088_v39  ;;  %2743 = vmatpush1.bf16.msra.mxu1 %v2742_v18  ;;  %v2748_v55 = vpack.c.bf16 %v1774_v13, %v1772_v0  ;;  %v2957_v0 = vld [vmem:[%s3922_s0 + $0x18] sm:$0xff] }
 0x576   :  { %v2930_v37 = vpop.eup %2929  ;;  %2745 = vmatprep.subr.bf16.mxu1 %v2744_v7 }
 0x577   :  { %v1535_v14 = vmul.f32 %v2930_v37, %v3821_v63  ;;  %v1642_v63 = vld [vmem:[#allocation2 + $0xc0] sm:$0xff]  ;;  %v2750_v37 = vpack.c.bf16 %v1773_v58, %v1771_v61 }
 0x578   :  { %1564 = vperm.xlu1 %2856, %v1534_v60   ;;  %2715 = vmatpush3.bf16.msra.mxu0 %v2714_v47  ;;  %v2717_v53 = vpack.c.bf16 %v1643_v33, %v1642_v63  ;;  %v1776_v60 = vld [vmem:[#allocation5 + $0x2c8] sm:$0xff]  ;;  %v1781_v47 = vld [vmem:[#allocation5 + $0x2f0] sm:$0xff]  ;;  %v1786_v33 = vld [vmem:[#allocation5 + $0x318] sm:$0xff] }
 0x579   :  { %1569 = vperm.xlu0 %2855, %v1535_v14   ;;  %2716 = vmatprep.subr.bf16.mxu0 %v3088_v39  ;;  %v2752_v14 = vpack.c.bf16 %v1778_v21, %v1776_v60  ;;  %v1784_v63 = vld [vmem:[#allocation5 + $0x308] sm:$0xff] }
 0x57a   :  { %v2932_v28 = vpop.eup %2931  ;;  %2747 = vmatpush1.bf16.msra.mxu1 %v2746_v34  ;;  %v2760_v59 = vpack.c.bf16 %v1786_v33, %v1784_v63 }
 0x57b   :  { %v1536_v35 = vmul.f32 %v2932_v28, %v1456_v17  ;;  %v1649_v17 = vld [vmem:[#allocation2 + $0xf8] sm:$0xff]  ;;  %2749 = vmatprep.subr.bf16.mxu1 %v2748_v55 }
 0x57c   :  { %2718 = vmatpush3.bf16.msra.mxu0 %v2717_v53  ;;  %v2726_v44 = vpack.c.bf16 %v1649_v17, %v1648_v31  ;;  %v1782_v28 = vld [vmem:[#allocation5 + $0x2f8] sm:$0xff]  ;;  %v2758_v53 = vpack.c.bf16 %v1781_v47, %v1779_v15  ;;  %v2764_v31 = vpack.c.bf16 %v1790_v10, %v1788_v57  ;;  %v1787_v17 = vld [vmem:[#allocation5 + $0x320] sm:$0xff] }
 0x57d   :  { %1574 = vperm.xlu1 %2856, %v1536_v35   ;;  %2719 = vmatprep.subr.bf16.mxu0 %v3088_v39  ;;  %v2754_v35 = vpack.c.bf16 %v1777_v32, %v1775_v11  ;;  %v2756_v16 = vpack.c.bf16 %v1782_v28, %v1780_v2  ;;  %v2958_v11 = vld [vmem:[%s3922_s0 + $0x28] sm:$0xff] }
 0x57e   :  { %2751 = vmatpush1.bf16.msra.mxu1 %v2750_v37 }
 0x57f   :  { %2753 = vmatprep.subr.bf16.mxu1 %v2752_v14 }
 0x580   :  { %2721 = vmatpush3.bf16.msra.mxu0 %v2720_v62  ;;  %v1785_v62 = vld [vmem:[#allocation5 + $0x310] sm:$0xff] }
 0x581   :  { %2722 = vmatprep.subr.bf16.mxu0 %v3088_v39 }
 0x582   :  { %2755 = vmatpush1.bf16.msra.mxu1 %v2754_v35  ;;  %v2959_v35 = vld [vmem:[%s3922_s0 + $0x30] sm:$0xff] }
 0x583   :  { %2757 = vmatprep.subr.bf16.mxu1 %v2756_v16 }
 0x584   :  { %2724 = vmatpush3.bf16.msra.mxu0 %v2723_v4  ;;  %v2762_v4 = vpack.c.bf16 %v1785_v62, %v1783_v38 }
 0x585   :  { %2725 = vmatprep.subr.bf16.mxu0 %v3088_v39 }
 0x586   :  { %2759 = vmatpush1.bf16.msra.mxu1 %v2758_v53 }
 0x587   :  { %2761 = vmatprep.subr.bf16.mxu1 %v2760_v59 }
 0x588   :  { %2727 = vmatpush3.bf16.msra.mxu0 %v2726_v44  ;;  %v1789_v44 = vld [vmem:[#allocation5 + $0x330] sm:$0xff] }
 0x589   :  { %2792 = vmatprep.subr.bf16.mxu0 %v3088_v39  ;;  %v2766_v23 = vpack.c.bf16 %v1789_v44, %v1787_v17 }
 0x58a   :  { %2763 = vmatpush1.bf16.msra.mxu1 %v2762_v4 }
 0x58b   :  { %2765 = vmatprep.subr.bf16.mxu1 %v2764_v31  ;;  %v2960_v31 = vld [vmem:[%s3922_s0 + $0x38] sm:$0xff] }
 0x58e   :  { %2767 = vmatpush1.bf16.msra.mxu1 %v2766_v23 }
 0x58f   :  { %2769 = vmatprep.subr.bf16.mxu1 %v2768_v9 }
 0x592   :  { %2771 = vmatpush1.bf16.msra.mxu1 %v2770_v5 }
 0x5e5   :  { %v1540_v42 = vpop.permute.xlu0 %1539 }
 0x5e6   :  { %v1577_v51 = vmul.f32 %v2953_v26, %v1540_v42 }
 0x5e8   :  { %v1545_v54 = vpop.permute.xlu1 %1544  ;;  %v1585_v46 = vrot.slane %v1577_v51, 4 }
 0x5e9   :  { %v1578_v36 = vmul.f32 %v2954_v50, %v1545_v54 }
 0x5ea   :  { %v1586_v52 = vadd.f32 %v1585_v46, %v1577_v51 }
 0x5eb   :  { %v1591_v56 = vrot.slane %v1578_v36, 4 }
 0x5ec   :  { %v1550_v24 = vpop.permute.xlu0 %1549  ;;  %v1587_v34 = vrot.slane %v1586_v52, 2 }
 0x5ed   :  { %v1579_v20 = vmul.f32 %v2955_v45, %v1550_v24  ;;  %v1592_v49 = vadd.f32 %v1591_v56, %v1578_v36 }
 0x5ee   :  { %v1588_v28 = vadd.f32 %v1587_v34, %v1586_v52  ;;  %v1912_v52 = vld [vmem:[#allocation7 + $0x80] sm:$0xff] }
 0x5ef   :  { %v1597_v48 = vrot.slane %v1579_v20, 4  ;;  %v1593_v18 = vrot.slane %v1592_v49, 2 }
 0x5f0   :  { %v1560_v40 = vpop.permute.xlu0 %1559  ;;  %v1589_v10 = vrot.slane %v1588_v28, 1 }
 0x5f1   :  { %v1598_v43 = vadd.f32 %v1597_v48, %v1579_v20  ;;  %v1581_v6 = vmul.f32 %v2956_v3, %v1560_v40  ;;  %v1594_v58 = vadd.f32 %v1593_v18, %v1592_v49 }
 0x5f2   :  { %v1590_v42 = vadd.f32 %v1589_v10, %v1588_v28  ;;  %v1797_v28 = vld [vmem:[#allocation5 + $0x370] sm:$0xff]  ;;  %v1804_v10 = vld [vmem:[#allocation5 + $0x3a8] sm:$0xff] }
 0x5f3   :  { %v1555_v7 = vpop.permute.xlu1 %1554  ;;  %v1609_v8 = vrot.slane %v1581_v6, 4  ;;  %v1599_v1 = vrot.slane %v1598_v43, 2  ;;  %v1595_v63 = vrot.slane %v1594_v58, 1 }
 0x5f4   :  { %v1580_v13 = vmul.f32 %v2957_v0, %v1555_v7  ;;  %v1914_v0 = vld [vmem:[#allocation7 + $0x90] sm:$0xff] }
 0x5f5   :  { %v1610_v55 = vadd.f32 %v1609_v8, %v1581_v6  ;;  %v1600_v21 = vadd.f32 %v1599_v1, %v1598_v43  ;;  %v1596_v27 = vadd.f32 %v1595_v63, %v1594_v58  ;;  %v1913_v43 = vld [vmem:[#allocation7 + $0x88] sm:$0xff]  ;;  %v1920_v63 = vld [vmem:[#allocation7 + $0xc0] sm:$0xff] }
 0x5f6   :  { %v1603_v61 = vrot.slane %v1580_v13, 4  ;;  %v2793_v8 = vpack.c.bf16 %v1913_v43, %v1912_v52  ;;  %v1917_v58 = vld [vmem:[#allocation7 + $0xa8] sm:$0xff]  ;;  %v2147_v43 = vld [vmem:[%s3928_s6 + $0x1] ss:$0 sm:$0xff] }
 0x5f7   :  { %v1565_v60 = vpop.permute.xlu1 %1564  ;;  %v1611_v14 = vrot.slane %v1610_v55, 2  ;;  %v1601_v53 = vrot.slane %v1600_v21, 1  ;;  %v1666_v36 = vsel %vm359_vm0, %v1596_v27, %v1590_v42  ;;  %vm3955_vm0 = vcmask 1046534   ;;  %v1805_v27 = vld [vmem:[#allocation5 + $0x3b0] sm:$0xff] }
 0x5f8   :  { %v1604_v37 = vadd.f32 %v1603_v61, %v1580_v13  ;;  %v1582_v32 = vmul.f32 %v2958_v11, %v1565_v60  ;;  %v1570_v2 = vpop.permute.xlu0 %1569  ;;  %v1915_v13 = vld [vmem:[#allocation7 + $0x98] sm:$0xff]  ;;  %v1916_v61 = vld [vmem:[#allocation7 + $0xa0] sm:$0xff] }
 0x5f9   :  { %v1583_v16 = vmul.f32 %v2959_v35, %v1570_v2  ;;  %v1612_v38 = vadd.f32 %v1611_v14, %v1610_v55  ;;  %v1602_v30 = vadd.f32 %v1601_v53, %v1600_v21  ;;  %v2796_v55 = vpack.c.bf16 %v1915_v13, %v1914_v0  ;;  %v1796_v21 = vld [vmem:[#allocation5 + $0x368] sm:$0xff]  ;;  %v1918_v14 = vld [vmem:[#allocation7 + $0xb0] sm:$0xff]  ;;  %v1795_v2 = vld [vmem:[#allocation5 + $0x360] sm:$0xff] }
 0x5fa   :  { %v1605_v15 = vrot.slane %v1604_v37, 2  ;;  %v1615_v47 = vrot.slane %v1582_v32, 4  ;;  %v2799_v60 = vpack.c.bf16 %v1917_v58, %v1916_v61  ;;  %v1921_v53 = vld [vmem:[#allocation7 + $0xc8] sm:$0xff]  ;;  %v2009_v61 = vld [vmem:[#allocation8 + $0x90] sm:$0xff]  ;;  %v2010_v58 = vld [vmem:[#allocation8 + $0x98] sm:$0xff] }
 0x5fb   :  { %v1621_v33 = vrot.slane %v1583_v16, 4  ;;  %v1613_v22 = vrot.slane %v1612_v38, 1  ;;  %v1667_v46 = vsel %vm362_vm1, %v1602_v30, %v1666_v36  ;;  %vm3956_vm1 = vcmask 1047559   ;;  %v1808_v30 = vld [vmem:[#allocation5 + $0x3c8] sm:$0xff]  ;;  %v1814_v36 = vld [vmem:[#allocation5 + $0x3f8] sm:$0xff] }
 0x5fc   :  { %v1606_v59 = vadd.f32 %v1605_v15, %v1604_v37  ;;  %v1616_v62 = vadd.f32 %v1615_v47, %v1582_v32  ;;  %v1575_v57 = vpop.permute.xlu1 %1574  ;;  %v1798_v37 = vld [vmem:[#allocation5 + $0x378] sm:$0xff]  ;;  %v1800_v15 = vld [vmem:[#allocation5 + $0x388] sm:$0xff] }
 0x5fd   :  { %v1622_v4 = vadd.f32 %v1621_v33, %v1583_v16  ;;  %v1584_v17 = vmul.f32 %v2960_v31, %v1575_v57  ;;  %v1614_v45 = vadd.f32 %v1613_v22, %v1612_v38  ;;  %v2772_v11 = vpack.c.bf16 %v1798_v37, %v1796_v21  ;;  %v1919_v32 = vld [vmem:[#allocation7 + $0xb8] sm:$0xff]  ;;  %v1801_v38 = vld [vmem:[#allocation5 + $0x390] sm:$0xff]  ;;  %v2008_v0 = vld [vmem:[#allocation8 + $0x88] sm:$0xff] }
 0x5fe   :  { %v1607_v44 = vrot.slane %v1606_v59, 1  ;;  %v1617_v41 = vrot.slane %v1616_v62, 2  ;;  %v2802_v35 = vpack.c.bf16 %v1919_v32, %v1918_v14  ;;  %v2774_v16 = vpack.c.bf16 %v1797_v28, %v1795_v2  ;;  %v1802_v47 = vld [vmem:[#allocation5 + $0x398] sm:$0xff]  ;;  %v1922_v31 = vld [vmem:[#allocation7 + $0xd0] sm:$0xff]  ;;  %v2011_v37 = vld [vmem:[#allocation8 + $0xa0] sm:$0xff] }
 0x5ff   :  { %v1623_v23 = vrot.slane %v1622_v4, 2  ;;  %v1627_v9 = vrot.slane %v1584_v17, 4  ;;  %2773 = vmatprep.subr.bf16.mxu1 %v2772_v11  ;;  %v2776_v33 = vpack.c.bf16 %v1802_v47, %v1800_v15  ;;  %v1810_v22 = vld [vmem:[#allocation5 + $0x3d8] sm:$0xff]  ;;  %v2820_v21 = vpack.c.bf16 %v2010_v58, %v2009_v61  ;;  %v2012_v14 = vld [vmem:[#allocation8 + $0xa8] sm:$0xff]  ;;  %v2013_v32 = vld [vmem:[#allocation8 + $0xb0] sm:$0xff] }
 0x600   :  { %v1618_v5 = vadd.f32 %v1617_v41, %v1616_v62  ;;  %v1608_v54 = vadd.f32 %v1607_v44, %v1606_v59  ;;  %2775 = vmatpush1.bf16.msra.mxu1 %v2774_v16  ;;  %v1799_v59 = vld [vmem:[#allocation5 + $0x380] sm:$0xff]  ;;  %v2805_v62 = vpack.c.bf16 %v1921_v53, %v1920_v63  ;;  %v1923_v44 = vld [vmem:[#allocation7 + $0xd8] sm:$0xff]  ;;  %v2784_v42 = vpack.c.bf16 %v1810_v22, %v1808_v30  ;;  %v2016_v16 = vld [vmem:[#allocation8 + $0xc8] sm:$0xff] }
 0x601   :  { %v1624_v26 = vadd.f32 %v1623_v23, %v1622_v4  ;;  %v1628_v51 = vadd.f32 %v1627_v9, %v1584_v17  ;;  %v2778_v57 = vpack.c.bf16 %v1801_v38, %v1799_v59  ;;  %v1806_v4 = vld [vmem:[#allocation5 + $0x3b8] sm:$0xff]  ;;  %2777 = vmatprep.subr.bf16.mxu1 %v2776_v33  ;;  %v1803_v41 = vld [vmem:[#allocation5 + $0x3a0] sm:$0xff]  ;;  %v2808_v23 = vpack.c.bf16 %v1923_v44, %v1922_v31  ;;  %v2020_v53 = vld [vmem:[#allocation8 + $0xe8] sm:$0xff] }
 0x602   :  { %v1619_v50 = vrot.slane %v1618_v5, 1  ;;  %v1668_v20 = vsel %vm365_vm2, %v1608_v54, %v1667_v46  ;;  %vm3957_vm2 = vmmov 0   ;;  %v2780_v17 = vpack.c.bf16 %v1806_v4, %v1804_v10  ;;  %v1925_v54 = vld [vmem:[#allocation7 + $0xe8] sm:$0xff]  ;;  %v1926_v46 = vld [vmem:[#allocation7 + $0xf0] sm:$0xff]  ;;  %v2014_v2 = vld [vmem:[#allocation8 + $0xb8] sm:$0xff] }
 0x603   :  { %v1625_v56 = vrot.slane %v1624_v26, 1  ;;  %v1629_v24 = vrot.slane %v1628_v51, 2  ;;  %v1669_v6 = vsel %vm368_vm3, %v1614_v45, %v1668_v20  ;;  %v2782_v9 = vpack.c.bf16 %v1805_v27, %v1803_v41  ;;  %v1927_v20 = vld [vmem:[#allocation7 + $0xf8] sm:$0xff]  ;;  %v2019_v33 = vld [vmem:[#allocation8 + $0xe0] sm:$0xff]  ;;  %v2021_v38 = vld [vmem:[#allocation8 + $0xf0] sm:$0xff] }
 0x604   :  { %v1620_v49 = vadd.f32 %v1619_v50, %v1618_v5  ;;  %2779 = vmatpush1.bf16.msra.mxu1 %v2778_v57  ;;  %v1924_v5 = vld [vmem:[#allocation7 + $0xe0] sm:$0xff]  ;;  %v1812_v50 = vld [vmem:[#allocation5 + $0x3e8] sm:$0xff]  ;;  %v2823_v11 = vpack.c.bf16 %v2012_v14, %v2011_v37  ;;  %v2826_v28 = vpack.c.bf16 %v2014_v2, %v2013_v32  ;;  %v2018_v47 = vld [vmem:[#allocation8 + $0xd8] sm:$0xff]  ;;  %v2835_v59 = vpack.c.bf16 %v2020_v53, %v2019_v33 }
 0x605   :  { %v1630_v48 = vadd.f32 %v1629_v24, %v1628_v51  ;;  %v1626_v40 = vadd.f32 %v1625_v56, %v1624_v26  ;;  %2781 = vmatprep.subr.bf16.mxu1 %v2780_v17  ;;  %v1807_v26 = vld [vmem:[#allocation5 + $0x3c0] sm:$0xff]  ;;  %v1809_v51 = vld [vmem:[#allocation5 + $0x3d0] sm:$0xff]  ;;  %v2811_v56 = vpack.c.bf16 %v1925_v54, %v1924_v5  ;;  %v2788_v45 = vpack.c.bf16 %v1814_v36, %v1812_v50 }
 0x606   :  { %v1670_v7 = vsel %vm3954_vm8, %v1620_v49, %v1669_v6  ;;  %v2786_v24 = vpack.c.bf16 %v1809_v51, %v1807_v26  ;;  %v1811_v49 = vld [vmem:[#allocation5 + $0x3e0] sm:$0xff] }
 0x607   :  { %v1631_v3 = vrot.slane %v1630_v48, 1  ;;  %v1671_v1 = vsel %vm3955_vm0, %v1626_v40, %v1670_v7  ;;  %v2814_v40 = vpack.c.bf16 %v1927_v20, %v1926_v46  ;;  %v2149_v10 = vld [vmem:[%s3930_s8 + $0x2] sm:$0x3]  ;;  %v2153_v26 = vld [vmem:[%s3932_s10 + $0x1] ss:$0 sm:$0xff]  ;;  %s3049_s10 = scalar_lea.vmem %s2116_s11, 128 }
 0x608   :  { %2783 = vmatpush1.bf16.msra.mxu1 %v2782_v9  ;;  %v1821_v4 = vrot.slane %v2149_v10, %v3387_v25  ;;  %v1825_v9 = vrot.slane %v2149_v10, %v3384_v19  ;;  %v2155_v25 = vld [vmem:[%s3934_s12 + $0x1] ss:$0 sm:$0xff]  ;;  %p3050_p4 = scmp.ne.s32.totalorder %s2116_s11, %s3049_s10  ;;  %p3055_p6 = scmp.lt.s32.totalorder %s3049_s10, %s3049_s10 }
 0x609   :  { %v1632_v18 = vadd.f32 %v1631_v3, %v1630_v48  ;;  %2785 = vmatprep.subr.bf16.mxu1 %v2784_v42  ;;  %v1813_v48 = vld [vmem:[#allocation5 + $0x3f0] sm:$0xff] }
 0x60a   :  { %v2790_v52 = vpack.c.bf16 %v1813_v48, %v1811_v49  ;;  %p3056_p7 = por %p3055_p6, %p3054_p5 }
 0x60b   :  { %v1672_v34 = vsel %vm3956_vm1, %v1632_v18, %v1671_v1  ;;  %v2007_v1 = vld [vmem:[#allocation8 + $0x80] sm:$0xff] }
 0x60c   :  { %2464 = vmatmul.mubr.f32.vlgmr.msra.gmra.mrb[10].mxu0 %v1672_v34  ;;  %2787 = vmatpush1.bf16.msra.mxu1 %v2786_v24  ;;  %p3057_p8 = pnand %p3056_p7, %p3050_p4 }
 0x60d   :  { %2794 = vmatpush3.bf16.msra.mxu0 %v2793_v8  ;;  %2498 = vmatprep.mubr.msk.f32.mxu0 %vm3957_vm2, %v3090_v12 }
 0x60e   :  { %2795 = vmatprep.subr.bf16.mxu0 %v3088_v39  ;;  %2789 = vmatprep.subr.bf16.mxu1 %v2788_v45 }
 0x610   :  { %2791 = vmatpush1.bf16.msra.mxu1 %v2790_v52 }
 0x611   :  { %2797 = vmatpush3.bf16.msra.mxu0 %v2796_v55  ;;  %v2817_v55 = vpack.c.bf16 %v2008_v0, %v2007_v1 }
 0x612   :  { %2798 = vmatprep.subr.bf16.mxu0 %v3088_v39 }
 0x615   :  { %2800 = vmatpush3.bf16.msra.mxu0 %v2799_v60 }
 0x616   :  { %2801 = vmatprep.subr.bf16.mxu0 %v3088_v39 }
 0x619   :  { %2803 = vmatpush3.bf16.msra.mxu0 %v2802_v35  ;;  %v2015_v35 = vld [vmem:[#allocation8 + $0xc0] sm:$0xff] }
 0x61a   :  { %2804 = vmatprep.subr.bf16.mxu0 %v3088_v39  ;;  %v2829_v15 = vpack.c.bf16 %v2016_v16, %v2015_v35 }
 0x61d   :  { %2806 = vmatpush3.bf16.msra.mxu0 %v2805_v62  ;;  %v2022_v62 = vld [vmem:[#allocation8 + $0xf8] sm:$0xff] }
 0x61e   :  { %2807 = vmatprep.subr.bf16.mxu0 %v3088_v39  ;;  %v2838_v57 = vpack.c.bf16 %v2022_v62, %v2021_v38 }
 0x621   :  { %2809 = vmatpush3.bf16.msra.mxu0 %v2808_v23 }
 0x622   :  { %2810 = vmatprep.subr.bf16.mxu0 %v3088_v39 }
 0x625   :  { %2812 = vmatpush3.bf16.msra.mxu0 %v2811_v56 }
 0x626   :  { %2813 = vmatprep.subr.bf16.mxu0 %v3088_v39 }
 0x629   :  { %2815 = vmatpush3.bf16.msra.mxu0 %v2814_v40 }
 0x62a   :  { %2816 = vmatprep.subr.bf16.mxu0 %v3088_v39 }
 0x6df   :  { %v1740_v3 = vpop.f32.mrb[10].mxu0 }
 0x6e0   :  { %v1741_v6 = vadd.f32 %v2147_v43, %v1740_v3  ;;  %v2465_v18 = vpop.f32.mrb[11].mxu0 }
 0x6e2   :  { %v1745_v7 = vmin.f32 %v1741_v6, 0.0  ;;  %vm1744_vm3 = vcmp.gt.f32.partialorder %v1741_v6, 0.0 }
 0x6e4   :  { %v1746_v8 = vmul.f32 1.442695, %v1745_v7 }
 0x6e6   :  { %2933 = vpow2.f32 %v1746_v8 }
 0x6f0   :  { %v2934_v13 = vpop.eup %2933 }
 0x6f1   :  { %v2148_v34 = vadd.f32 -1.0, %v2934_v13 }
 0x6f3   :  { %v1749_v60 = vsel %vm1744_vm3, %v1741_v6, %v2148_v34 }
 0x6f4   :  { %1893 = vmatmul.mubr.f32.vlgmr.msra.gmra.mrb[6].mxu1 %v1749_v60  ;;  %2499 = vmatmul.mubr.f32.vlgmr.msra.gmra.mrb[12].mxu0 %v1749_v60 }
 0x6f5   :  { %2818 = vmatpush3.bf16.msra.mxu0 %v2817_v55  ;;  %2533 = vmatprep.mubr.msk.f32.mxu0 %vm3957_vm2, %v3090_v12  ;;  %v2017_v12 = vld [vmem:[#allocation8 + $0xd0] sm:$0xff] }
 0x6f6   :  { %2819 = vmatprep.subr.bf16.mxu0 %v3088_v39  ;;  %v2832_v63 = vpack.c.bf16 %v2018_v47, %v2017_v12 }
 0x6f9   :  { %2821 = vmatpush3.bf16.msra.mxu0 %v2820_v21 }
 0x6fa   :  { %2822 = vmatprep.subr.bf16.mxu0 %v3088_v39 }
 0x6fd   :  { %2824 = vmatpush3.bf16.msra.mxu0 %v2823_v11 }
 0x6fe   :  { %2825 = vmatprep.subr.bf16.mxu0 %v3088_v39 }
 0x701   :  { %2827 = vmatpush3.bf16.msra.mxu0 %v2826_v28 }
 0x702   :  { %2828 = vmatprep.subr.bf16.mxu0 %v3088_v39 }
 0x705   :  { %2830 = vmatpush3.bf16.msra.mxu0 %v2829_v15 }
 0x706   :  { %2831 = vmatprep.subr.bf16.mxu0 %v3088_v39 }
 0x709   :  { %2833 = vmatpush3.bf16.msra.mxu0 %v2832_v63 }
 0x70a   :  { %2834 = vmatprep.subr.bf16.mxu0 %v3088_v39 }
 0x70d   :  { %2836 = vmatpush3.bf16.msra.mxu0 %v2835_v59 }
 0x70e   :  { %2837 = vmatprep.subr.bf16.mxu0 %v3088_v39 }
 0x711   :  { %2839 = vmatpush3.bf16.msra.mxu0 %v2838_v57 }
 0x714   :  { %2534 = vmatmul.mubr.f32.vlgmr.msra.gmra.mrb[14].mxu0 %v3707_v29 }
 0x7c7   :  { %v1894_v31 = vpop.f32.mrb[6].mxu1  ;;  %v2002_v17 = vpop.f32.mrb[12].mxu0 }
 0x7c8   :  { %v1895_v44 = vadd.f32 %v1894_v31, %v1821_v4  ;;  %v1896_v41 = vpop.f32.mrb[7].mxu1  ;;  %v2500_v27 = vpop.f32.mrb[13].mxu0  ;;  %v2003_v56 = vadd.f32 %v2153_v26, %v2002_v17 }
 0x7c9   :  { %v1897_v30 = vadd.f32 %v1896_v41, %v1825_v9 }
 0x7ca   :  { %v2150_v23 = vmul.f32 -1.442695, %v1895_v44 }
 0x7cb   :  { %v2151_v39 = vmul.f32 -1.442695, %v1897_v30 }
 0x7cc   :  { %2935 = vpow2.f32 %v2150_v23 }
 0x7cd   :  { %2937 = vpow2.f32 %v2151_v39 }
 0x7d6   :  { %v2936_v22 = vpop.eup %2935 }
 0x7d7   :  { %v1902_v5 = vadd.f32 1.0, %v2936_v22  ;;  %v2938_v42 = vpop.eup %2937 }
 0x7d8   :  { %v1908_v54 = vadd.f32 1.0, %v2938_v42 }
 0x7d9   :  { %2939 = vrcp.f32 %v1902_v5 }
 0x7da   :  { %2941 = vrcp.f32 %v1908_v54 }
 0x7e3   :  { %v2940_v36 = vpop.eup %2939 }
 0x7e4   :  { %v2942_v45 = vpop.eup %2941 }
 0x7e5   :  { %v2104_v20 = vsub.f32 1.0, %v2942_v45  ;;  %v2106_v40 = vmul.f32 %v2942_v45, %v3707_v29 }
 0x7e7   :  { %v2097_v51 = vpop.f32.mrb[14].mxu0 }
 0x7e8   :  { %v2098_v50 = vadd.f32 %v2155_v25, %v2097_v51  ;;  %v2535_v19 = vpop.f32.mrb[15].mxu0 }
 0x7ea   :  { %v2101_v24 = vmul.f32 %v2940_v36, %v2098_v50 }
 0x7ec   :  { %v2102_v46 = vadd.f32 %v2101_v24, %v2003_v56 }
 0x7ee   :  { %2943 = vtanh.f32 %v2102_v46 }
 0x7f8   :  { %v2944_v49 = vpop.eup %2943 }
 0x7f9   :  { %v2105_v48 = vmul.f32 %v2944_v49, %v2104_v20 }
 0x7fb   :  { %v2107_v52 = vadd.f32 %v2106_v40, %v2105_v48 }
 0x7fd   :  { %2108 = vst [vmem:[#allocation10] sm:$0xff] %v2107_v52 }
 0x7fe   :  { %3060 = shalt.err (!%p3057_p8)
}
 0x7ff   :  { %s3061_s2 = scalar_lea.hbm %s3935_s13, 128 }
 0x800   :  { %p3062_p9 = scmp.ne.s32.totalorder %s3935_s13, %s3061_s2  ;;  %p3065_p10 = scmp.lt.u32.totalorder %s3061_s2, %s3935_s13 }
 0x802   :  { %p3067_p11 = pnand %p3065_p10, %p3062_p9 }
 0x804   :  { %3070 = shalt.err (!%p3067_p11)
}
 0x805   :  { %2118 = dma.vmem_to_hbm [thread:$0]  %s2116_s11, 128, %s3935_s13, [#allocation4]  }
 0x806   :  { %3077 = dma.done.wait [#allocation4], 128  }
 0x807   :  { %3078 = vsyncadd [#allocation4], 4294967168 }
 0x808   :  { %2122 = vsyncpa [#allocation3], 1 }
 0x809   :  { %2123 = vsyncpa [#allocation6], 1 }
 0x80a   :  { %2124 = vsyncpa [#allocation9], 1 }
 0x80b   :  { %2125 = vsyncpa [#allocation4], 1 }

</bundles_post_ra>
